<compile_context>
chip_gen: v7x
topology: tpu7x:2x2x1
jax: 0.10.0
libtpu: 0.0.40
codegen_flags: <defaults>
</compile_context>

<pallas_src>
import numpy as np
import jax
import jax.numpy as jnp
from jax import lax
from jax.experimental import pallas as pl
from jax.experimental.pallas import tpu as pltpu

# ---- small synthetic CLIP text transformer config -------------------------------
B, L = 2, 8            # batch, context length         (real CLIP: 77)
D, H = 64, 4           # transformer width / heads     (ViT-B/32:   512 / 8)
HD = D // H            # head dim
MLP = 4 * D            # MLP hidden
LAYERS = 2             # transformer layers            (real CLIP: 12)
VOCAB = 128            # vocab size                    (real CLIP: 49408)
EMBED = 32             # text projection dim           (real CLIP: 512)
EPS = 1e-5
R = B * L              # flattened rows


def _ln(x, g, b):
    mu = jnp.mean(x, axis=-1, keepdims=True)
    var = jnp.mean((x - mu) ** 2, axis=-1, keepdims=True)
    return (x - mu) * lax.rsqrt(var + EPS) * g + b


# ---- Pallas kernel: full text transformer + head, one layer per grid step ---------
def _encode_kernel(eot_ref,                                   # SMEM scalar prefetch (B,)
                   x_ref, bias_ref,
                   ln1g, ln1b, wq, bq, wk, bk, wv, bv, wo, bo,
                   ln2g, ln2b, w1, b1, w2, b2,
                   lnfg, lnfb, proj,
                   o_ref, xs):
    l = pl.program_id(0)

    @pl.when(l == 0)
    def _():
        xs[...] = x_ref[...]                                  # (R, D) f32 activations

    x = xs[...]

    # ---- attention -------------------------------------------------------------
    xn = _ln(x, ln1g[0], ln1b[0])
    xb = xn.astype(jnp.bfloat16)
    q = jnp.dot(xb, wq[0], preferred_element_type=jnp.float32) + bq[0]
    k = jnp.dot(xb, wk[0], preferred_element_type=jnp.float32) + bk[0]
    v = jnp.dot(xb, wv[0], preferred_element_type=jnp.float32) + bv[0]

    scale = jnp.float32(1.0 / np.sqrt(HD))
    bias = bias_ref[...]                                      # block-diag causal bias
    heads = []
    for h in range(H):                                        # static unroll
        sl = slice(h * HD, (h + 1) * HD)
        qh, kh, vh = q[:, sl], k[:, sl], v[:, sl]
        s = jnp.dot(qh, kh.T, preferred_element_type=jnp.float32) * scale + bias
        s = s - jnp.max(s, axis=-1, keepdims=True)
        p = jnp.exp(s)
        p = p * pl.reciprocal(jnp.sum(p, axis=-1, keepdims=True), approx=True)
        heads.append(jnp.dot(p, vh, preferred_element_type=jnp.float32))
    ah = jnp.concatenate(heads, axis=-1)                      # (R, D)
    attn = jnp.dot(ah.astype(jnp.bfloat16), wo[0],
                   preferred_element_type=jnp.float32) + bo[0]
    x = x + attn

    # ---- MLP (QuickGELU) ---------------------------------------------------------
    xn2 = _ln(x, ln2g[0], ln2b[0])
    hid = jnp.dot(xn2.astype(jnp.bfloat16), w1[0],
                  preferred_element_type=jnp.float32) + b1[0]
    hid = hid * jax.nn.sigmoid(1.702 * hid)
    m = jnp.dot(hid.astype(jnp.bfloat16), w2[0],
                preferred_element_type=jnp.float32) + b2[0]
    x = x + m
    xs[...] = x

    # ---- final LN + EOT gather + text projection (last layer only) ----------------
    @pl.when(l == LAYERS - 1)
    def _():
        rows = [xs[pl.ds(eot_ref[b], 1), :] for b in range(B)]   # (1, D) each
        eotx = jnp.concatenate(rows, axis=0)                     # (B, D)
        rn = _ln(eotx, lnfg[...], lnfb[...])
        o_ref[...] = jnp.dot(rn.astype(jnp.bfloat16), proj[...],
                             preferred_element_type=jnp.float32)


def clip_encode_text(tokens, params):
    # token embedding gather + positional embedding (glue), flatten batch into rows
    x0 = (params['tok_emb'][tokens] + params['pos_emb'][None]).reshape(R, D)
    # EOT token = highest id in each sequence (CLIP convention); flat row indices
    eot_idx = jnp.argmax(tokens, axis=-1).astype(jnp.int32)
    eot_flat = jnp.arange(B, dtype=jnp.int32) * L + eot_idx

    # block-diagonal causal additive bias, built once outside the kernel
    ri = np.arange(R)[:, None]
    ci = np.arange(R)[None, :]
    ok = (ri // L == ci // L) & (ci % L <= ri % L)
    attn_bias = jnp.asarray(np.where(ok, 0.0, -1e30), dtype=jnp.float32)

    const2 = lambda l, eot: (0, 0)
    layer3 = lambda l, eot: (l, 0, 0)

    in_specs = [
        pl.BlockSpec((R, D), const2),        # x0
        pl.BlockSpec((R, R), const2),        # attention bias
        pl.BlockSpec((1, 1, D), layer3),     # ln1 gamma
        pl.BlockSpec((1, 1, D), layer3),     # ln1 beta
        pl.BlockSpec((1, D, D), layer3),     # Wq
        pl.BlockSpec((1, 1, D), layer3),     # bq
        pl.BlockSpec((1, D, D), layer3),     # Wk
        pl.BlockSpec((1, 1, D), layer3),     # bk
        pl.BlockSpec((1, D, D), layer3),     # Wv
        pl.BlockSpec((1, 1, D), layer3),     # bv
        pl.BlockSpec((1, D, D), layer3),     # Wo
        pl.BlockSpec((1, 1, D), layer3),     # bo
        pl.BlockSpec((1, 1, D), layer3),     # ln2 gamma
        pl.BlockSpec((1, 1, D), layer3),     # ln2 beta
        pl.BlockSpec((1, D, MLP), layer3),   # c_fc W
        pl.BlockSpec((1, 1, MLP), layer3),   # c_fc b
        pl.BlockSpec((1, MLP, D), layer3),   # c_proj W
        pl.BlockSpec((1, 1, D), layer3),     # c_proj b
        pl.BlockSpec((1, D), const2),        # ln_final gamma
        pl.BlockSpec((1, D), const2),        # ln_final beta
        pl.BlockSpec((D, EMBED), const2),    # text_projection
    ]
    gs = pltpu.PrefetchScalarGridSpec(
        num_scalar_prefetch=1,
        grid=(LAYERS,),
        in_specs=in_specs,
        out_specs=pl.BlockSpec((B, EMBED), const2),
        scratch_shapes=[pltpu.VMEM((R, D), jnp.float32)],
    )
    return pl.pallas_call(
        _encode_kernel,
        out_shape=jax.ShapeDtypeStruct((B, EMBED), jnp.float32),
        grid_spec=gs,
        compiler_params=pltpu.CompilerParams(dimension_semantics=("arbitrary",)),
    )(eot_flat, x0, attn_bias,
      params['ln1g'], params['ln1b'],
      params['wq'], params['bq'], params['wk'], params['bk'],
      params['wv'], params['bv'], params['wo'], params['bo'],
      params['ln2g'], params['ln2b'],
      params['w1'], params['b1'], params['w2'], params['b2'],
      params['lnfg'], params['lnfb'], params['proj'])


# ---- parameters (deterministic synthetic init; stands in for clip.load) -----------
def init_params(key):
    cnt = [0]

    def nrm(shape, s, dtype=jnp.float32):
        cnt[0] += 1
        k = jax.random.fold_in(key, cnt[0])
        return (s * jax.random.normal(k, shape, jnp.float32)).astype(dtype)

    return {
        'tok_emb': nrm((VOCAB, D), 0.02),
        'pos_emb': nrm((L, D), 0.01),
        # per-layer weights stacked along a leading LAYERS axis (streamed by BlockSpec)
        'ln1g': 1.0 + nrm((LAYERS, 1, D), 0.1),
        'ln1b': nrm((LAYERS, 1, D), 0.02),
        'wq': nrm((LAYERS, D, D), 0.02, jnp.bfloat16),
        'bq': nrm((LAYERS, 1, D), 0.01),
        'wk': nrm((LAYERS, D, D), 0.02, jnp.bfloat16),
        'bk': nrm((LAYERS, 1, D), 0.01),
        'wv': nrm((LAYERS, D, D), 0.02, jnp.bfloat16),
        'bv': nrm((LAYERS, 1, D), 0.01),
        'wo': nrm((LAYERS, D, D), 0.02, jnp.bfloat16),
        'bo': nrm((LAYERS, 1, D), 0.01),
        'ln2g': 1.0 + nrm((LAYERS, 1, D), 0.1),
        'ln2b': nrm((LAYERS, 1, D), 0.02),
        'w1': nrm((LAYERS, D, MLP), 0.02, jnp.bfloat16),
        'b1': nrm((LAYERS, 1, MLP), 0.01),
        'w2': nrm((LAYERS, MLP, D), 0.02, jnp.bfloat16),
        'b2': nrm((LAYERS, 1, D), 0.01),
        'lnfg': 1.0 + nrm((1, D), 0.1),
        'lnfb': nrm((1, D), 0.02),
        'proj': nrm((D, EMBED), 0.02, jnp.bfloat16),
    }


# ---- pure-JAX reference for verification ------------------------------------------
def reference_encode_text(tokens, params):
    hp = lax.Precision.HIGHEST
    x = params['tok_emb'][tokens] + params['pos_emb'][None]          # (B, L, D) f32
    causal = jnp.asarray(np.triu(np.ones((L, L), bool), 1))
    for l in range(LAYERS):
        xn = _ln(x, params['ln1g'][l], params['ln1b'][l])
        xb = xn.astype(jnp.bfloat16)
        q = jnp.einsum('bld,de->ble', xb, params['wq'][l],
                       preferred_element_type=jnp.float32) + params['bq'][l]
        k = jnp.einsum('bld,de->ble', xb, params['wk'][l],
                       preferred_element_type=jnp.float32) + params['bk'][l]
        v = jnp.einsum('bld,de->ble', xb, params['wv'][l],
                       preferred_element_type=jnp.float32) + params['bv'][l]
        heads = []
        for h in range(H):
            sl = slice(h * HD, (h + 1) * HD)
            s = jnp.einsum('bqe,bke->bqk', q[..., sl], k[..., sl],
                           precision=hp) / np.sqrt(HD)
            s = jnp.where(causal, -1e30, s)
            p = jax.nn.softmax(s, axis=-1)
            heads.append(jnp.einsum('bqk,bke->bqe', p, v[..., sl], precision=hp))
        ah = jnp.concatenate(heads, axis=-1)
        attn = jnp.einsum('bld,de->ble', ah.astype(jnp.bfloat16), params['wo'][l],
                          preferred_element_type=jnp.float32) + params['bo'][l]
        x = x + attn
        xn2 = _ln(x, params['ln2g'][l], params['ln2b'][l])
        hid = jnp.einsum('bld,dm->blm', xn2.astype(jnp.bfloat16), params['w1'][l],
                         preferred_element_type=jnp.float32) + params['b1'][l]
        hid = hid * jax.nn.sigmoid(1.702 * hid)
        x = x + jnp.einsum('blm,md->bld', hid.astype(jnp.bfloat16), params['w2'][l],
                           preferred_element_type=jnp.float32) + params['b2'][l]
    eot = jnp.argmax(tokens, axis=-1)
    row = x[jnp.arange(B), eot]                                       # (B, D)
    rn = _ln(row, params['lnfg'], params['lnfb'])
    return jnp.einsum('bd,de->be', rn.astype(jnp.bfloat16), params['proj'],
                      preferred_element_type=jnp.float32)


if __name__ == "__main__":
    params = init_params(jax.random.PRNGKey(0))

    # synthetic "tokenized" text: [SOT, ...body..., EOT, 0-padding]; EOT is the
    # highest vocab id so argmax finds its position (matches CLIP's convention).
    sot, eot_id = VOCAB - 2, VOCAB - 1
    rng = np.random.default_rng(0)
    tok_np = np.zeros((B, L), np.int32)
    for i, n in enumerate([5, 7]):                 # sequence lengths (incl. SOT/EOT)
        tok_np[i, 0] = sot
        tok_np[i, 1:n - 1] = rng.integers(1, VOCAB - 2, size=n - 2)
        tok_np[i, n - 1] = eot_id
    tokens = jnp.asarray(tok_np)

    out = jax.block_until_ready(clip_encode_text(tokens, params))
    ref = jax.block_until_ready(reference_encode_text(tokens, params))

    assert out.shape == (B, EMBED) and out.dtype == jnp.float32
    err = float(np.max(np.abs(np.asarray(out) - np.asarray(ref))))
    assert np.allclose(np.asarray(out), np.asarray(ref), rtol=2e-2, atol=2e-2), (
        f"max abs diff {err}")
    print("KERNEL_OK")
</pallas_src>

<mosaic_0001>
module attributes {stable_mosaic.version = 11 : i64} {
  func.func @_encode_kernel(%arg0: i32, %arg1: memref<2xi32, #tpu.memory_space<smem>>, %arg2: memref<16x64xf32, #tpu.memory_space<vmem>>, %arg3: memref<16x16xf32, #tpu.memory_space<vmem>>, %arg4: memref<1x1x64xf32, #tpu.memory_space<vmem>>, %arg5: memref<1x1x64xf32, #tpu.memory_space<vmem>>, %arg6: memref<1x64x64xbf16, #tpu.memory_space<vmem>>, %arg7: memref<1x1x64xf32, #tpu.memory_space<vmem>>, %arg8: memref<1x64x64xbf16, #tpu.memory_space<vmem>>, %arg9: memref<1x1x64xf32, #tpu.memory_space<vmem>>, %arg10: memref<1x64x64xbf16, #tpu.memory_space<vmem>>, %arg11: memref<1x1x64xf32, #tpu.memory_space<vmem>>, %arg12: memref<1x64x64xbf16, #tpu.memory_space<vmem>>, %arg13: memref<1x1x64xf32, #tpu.memory_space<vmem>>, %arg14: memref<1x1x64xf32, #tpu.memory_space<vmem>>, %arg15: memref<1x1x64xf32, #tpu.memory_space<vmem>>, %arg16: memref<1x64x256xbf16, #tpu.memory_space<vmem>>, %arg17: memref<1x1x256xf32, #tpu.memory_space<vmem>>, %arg18: memref<1x256x64xbf16, #tpu.memory_space<vmem>>, %arg19: memref<1x1x64xf32, #tpu.memory_space<vmem>>, %arg20: memref<1x64xf32, #tpu.memory_space<vmem>>, %arg21: memref<1x64xf32, #tpu.memory_space<vmem>>, %arg22: memref<64x32xbf16, #tpu.memory_space<vmem>>, %arg23: memref<2x32xf32, #tpu.memory_space<vmem>>, %arg24: memref<16x64xf32, #tpu.memory_space<vmem>>) attributes {dimension_semantics = [#tpu.dimension_semantics<arbitrary>], iteration_bounds = array<i64: 2>, scalar_prefetch = 1 : i64, scratch_operands = 1 : i64, tpu.core_type = #tpu.core_type<tc>, window_params = [{pipeline_mode = #tpu.pipeline_mode<synchronous>, transform_indices = @transform_0, window_bounds = array<i64: 16, 64>}, {pipeline_mode = #tpu.pipeline_mode<synchronous>, transform_indices = @transform_1, window_bounds = array<i64: 16, 16>}, {transform_indices = @transform_2, window_bounds = array<i64: 1, 1, 64>}, {transform_indices = @transform_3, window_bounds = array<i64: 1, 1, 64>}, {transform_indices = @transform_4, window_bounds = array<i64: 1, 64, 64>}, {transform_indices = @transform_5, window_bounds = array<i64: 1, 1, 64>}, {transform_indices = @transform_6, window_bounds = array<i64: 1, 64, 64>}, {transform_indices = @transform_7, window_bounds = array<i64: 1, 1, 64>}, {transform_indices = @transform_8, window_bounds = array<i64: 1, 64, 64>}, {transform_indices = @transform_9, window_bounds = array<i64: 1, 1, 64>}, {transform_indices = @transform_10, window_bounds = array<i64: 1, 64, 64>}, {transform_indices = @transform_11, window_bounds = array<i64: 1, 1, 64>}, {transform_indices = @transform_12, window_bounds = array<i64: 1, 1, 64>}, {transform_indices = @transform_13, window_bounds = array<i64: 1, 1, 64>}, {transform_indices = @transform_14, window_bounds = array<i64: 1, 64, 256>}, {transform_indices = @transform_15, window_bounds = array<i64: 1, 1, 256>}, {transform_indices = @transform_16, window_bounds = array<i64: 1, 256, 64>}, {transform_indices = @transform_17, window_bounds = array<i64: 1, 1, 64>}, {pipeline_mode = #tpu.pipeline_mode<synchronous>, transform_indices = @transform_18, window_bounds = array<i64: 1, 64>}, {pipeline_mode = #tpu.pipeline_mode<synchronous>, transform_indices = @transform_19, window_bounds = array<i64: 1, 64>}, {pipeline_mode = #tpu.pipeline_mode<synchronous>, transform_indices = @transform_20, window_bounds = array<i64: 64, 32>}, {pipeline_mode = #tpu.pipeline_mode<synchronous>, transform_indices = @transform_21, window_bounds = array<i64: 2, 32>}]} {
    %c0_i32 = arith.constant 0 : i32
    %0 = arith.cmpi eq, %arg0, %c0_i32 : i32
    %1 = arith.extui %0 : i1 to i32
    %c0_i32_0 = arith.constant 0 : i32
    %2 = arith.cmpi ne, %1, %c0_i32_0 : i32
    scf.if %2 {
      %c0_92 = arith.constant 0 : index
      %c0_93 = arith.constant 0 : index
      %194 = vector.load %arg2[%c0_92, %c0_93] : memref<16x64xf32, #tpu.memory_space<vmem>>, vector<16x64xf32>
      %c0_94 = arith.constant 0 : index
      %c0_95 = arith.constant 0 : index
      %195 = vector.load %arg24[%c0_94, %c0_95] : memref<16x64xf32, #tpu.memory_space<vmem>>, vector<16x64xf32>
      tpu.vector_store %arg24[%c0_94, %c0_95], %194 {strides = array<i32>} : memref<16x64xf32, #tpu.memory_space<vmem>>, vector<16x64xf32>,
    } else {
    }
    %c0 = arith.constant 0 : index
    %c0_1 = arith.constant 0 : index
    %3 = vector.load %arg24[%c0, %c0_1] : memref<16x64xf32, #tpu.memory_space<vmem>>, vector<16x64xf32>
    %c0_2 = arith.constant 0 : index
    %c0_3 = arith.constant 0 : index
    %c0_4 = arith.constant 0 : index
    %4 = vector.load %arg4[%c0_2, %c0_3, %c0_4] : memref<1x1x64xf32, #tpu.memory_space<vmem>>, vector<1x1x64xf32>
    %5 = vector.shape_cast %4 : vector<1x1x64xf32> to vector<1x64xf32>
    %c0_5 = arith.constant 0 : index
    %c0_6 = arith.constant 0 : index
    %c0_7 = arith.constant 0 : index
    %6 = vector.load %arg5[%c0_5, %c0_6, %c0_7] : memref<1x1x64xf32, #tpu.memory_space<vmem>>, vector<1x1x64xf32>
    %7 = vector.shape_cast %6 : vector<1x1x64xf32> to vector<1x64xf32>
    %cst = arith.constant dense<0.000000e+00> : vector<16xf32>
    %8 = vector.multi_reduction <add>, %3, %cst [1] : vector<16x64xf32> to vector<16xf32>
    %9 = vector.shape_cast %8 : vector<16xf32> to vector<16x1xf32>
    %cst_8 = arith.constant 6.400000e+01 : f32
    %10 = vector.broadcast %cst_8 : f32 to vector<16x1xf32>
    %11 = arith.divf %9, %10 : vector<16x1xf32>
    %12 = vector.broadcast %11 : vector<16x1xf32> to vector<16x64xf32>
    %13 = arith.subf %3, %12 : vector<16x64xf32>
    %14 = arith.mulf %13, %13 : vector<16x64xf32>
    %cst_9 = arith.constant dense<0.000000e+00> : vector<16xf32>
    %15 = vector.multi_reduction <add>, %14, %cst_9 [1] : vector<16x64xf32> to vector<16xf32>
    %16 = vector.shape_cast %15 : vector<16xf32> to vector<16x1xf32>
    %cst_10 = arith.constant 6.400000e+01 : f32
    %17 = vector.broadcast %cst_10 : f32 to vector<16x1xf32>
    %18 = arith.divf %16, %17 : vector<16x1xf32>
    %19 = vector.broadcast %11 : vector<16x1xf32> to vector<16x64xf32>
    %20 = arith.subf %3, %19 : vector<16x64xf32>
    %cst_11 = arith.constant 9.99999974E-6 : f32
    %21 = vector.broadcast %cst_11 : f32 to vector<16x1xf32>
    %22 = arith.addf %18, %21 : vector<16x1xf32>
    %23 = math.rsqrt %22 : vector<16x1xf32>
    %24 = vector.broadcast %23 : vector<16x1xf32> to vector<16x64xf32>
    %25 = arith.mulf %20, %24 : vector<16x64xf32>
    %26 = vector.broadcast %5 : vector<1x64xf32> to vector<16x64xf32>
    %27 = arith.mulf %25, %26 : vector<16x64xf32>
    %28 = vector.broadcast %7 : vector<1x64xf32> to vector<16x64xf32>
    %29 = arith.addf %27, %28 : vector<16x64xf32>
    %30 = arith.truncf %29 : vector<16x64xf32> to vector<16x64xbf16>
    %c0_12 = arith.constant 0 : index
    %c0_13 = arith.constant 0 : index
    %c0_14 = arith.constant 0 : index
    %31 = vector.load %arg6[%c0_12, %c0_13, %c0_14] : memref<1x64x64xbf16, #tpu.memory_space<vmem>>, vector<1x64x64xbf16>
    %32 = vector.shape_cast %31 : vector<1x64x64xbf16> to vector<64x64xbf16>
    %cst_15 = arith.constant dense<0.000000e+00> : vector<16x64xf32>
    %33 = tpu.matmul %30, %32, %cst_15 {dimension_numbers = #tpu.dot_dimension_numbers<[1], [0], [0], [1], [0, 0, 1, 1], [], []>} : vector<16x64xbf16>, vector<64x64xbf16>, vector<16x64xf32> -> vector<16x64xf32>
    %c0_16 = arith.constant 0 : index
    %c0_17 = arith.constant 0 : index
    %c0_18 = arith.constant 0 : index
    %34 = vector.load %arg7[%c0_16, %c0_17, %c0_18] : memref<1x1x64xf32, #tpu.memory_space<vmem>>, vector<1x1x64xf32>
    %35 = vector.shape_cast %34 : vector<1x1x64xf32> to vector<1x64xf32>
    %36 = vector.broadcast %35 : vector<1x64xf32> to vector<16x64xf32>
    %37 = arith.addf %33, %36 : vector<16x64xf32>
    %c0_19 = arith.constant 0 : index
    %c0_20 = arith.constant 0 : index
    %c0_21 = arith.constant 0 : index
    %38 = vector.load %arg8[%c0_19, %c0_20, %c0_21] : memref<1x64x64xbf16, #tpu.memory_space<vmem>>, vector<1x64x64xbf16>
    %39 = vector.shape_cast %38 : vector<1x64x64xbf16> to vector<64x64xbf16>
    %cst_22 = arith.constant dense<0.000000e+00> : vector<16x64xf32>
    %40 = tpu.matmul %30, %39, %cst_22 {dimension_numbers = #tpu.dot_dimension_numbers<[1], [0], [0], [1], [0, 0, 1, 1], [], []>} : vector<16x64xbf16>, vector<64x64xbf16>, vector<16x64xf32> -> vector<16x64xf32>
    %c0_23 = arith.constant 0 : index
    %c0_24 = arith.constant 0 : index
    %c0_25 = arith.constant 0 : index
    %41 = vector.load %arg9[%c0_23, %c0_24, %c0_25] : memref<1x1x64xf32, #tpu.memory_space<vmem>>, vector<1x1x64xf32>
    %42 = vector.shape_cast %41 : vector<1x1x64xf32> to vector<1x64xf32>
    %43 = vector.broadcast %42 : vector<1x64xf32> to vector<16x64xf32>
    %44 = arith.addf %40, %43 : vector<16x64xf32>
    %c0_26 = arith.constant 0 : index
    %c0_27 = arith.constant 0 : index
    %c0_28 = arith.constant 0 : index
    %45 = vector.load %arg10[%c0_26, %c0_27, %c0_28] : memref<1x64x64xbf16, #tpu.memory_space<vmem>>, vector<1x64x64xbf16>
    %46 = vector.shape_cast %45 : vector<1x64x64xbf16> to vector<64x64xbf16>
    %cst_29 = arith.constant dense<0.000000e+00> : vector<16x64xf32>
    %47 = tpu.matmul %30, %46, %cst_29 {dimension_numbers = #tpu.dot_dimension_numbers<[1], [0], [0], [1], [0, 0, 1, 1], [], []>} : vector<16x64xbf16>, vector<64x64xbf16>, vector<16x64xf32> -> vector<16x64xf32>
    %c0_30 = arith.constant 0 : index
    %c0_31 = arith.constant 0 : index
    %c0_32 = arith.constant 0 : index
    %48 = vector.load %arg11[%c0_30, %c0_31, %c0_32] : memref<1x1x64xf32, #tpu.memory_space<vmem>>, vector<1x1x64xf32>
    %49 = vector.shape_cast %48 : vector<1x1x64xf32> to vector<1x64xf32>
    %50 = vector.broadcast %49 : vector<1x64xf32> to vector<16x64xf32>
    %51 = arith.addf %47, %50 : vector<16x64xf32>
    %c0_33 = arith.constant 0 : index
    %c0_34 = arith.constant 0 : index
    %52 = vector.load %arg3[%c0_33, %c0_34] : memref<16x16xf32, #tpu.memory_space<vmem>>, vector<16x16xf32>
    %53 = vector.extract_strided_slice %37 {offsets = [0, 0], sizes = [16, 16], strides = [1, 1]} : vector<16x64xf32> to vector<16x16xf32>
    %54 = vector.extract_strided_slice %44 {offsets = [0, 0], sizes = [16, 16], strides = [1, 1]} : vector<16x64xf32> to vector<16x16xf32>
    %55 = vector.extract_strided_slice %51 {offsets = [0, 0], sizes = [16, 16], strides = [1, 1]} : vector<16x64xf32> to vector<16x16xf32>
    %56 = tpu.transpose %54, [1, 0] : vector<16x16xf32> -> vector<16x16xf32>
    %cst_35 = arith.constant dense<0.000000e+00> : vector<16x16xf32>
    %57 = tpu.matmul %53, %56, %cst_35 {dimension_numbers = #tpu.dot_dimension_numbers<[1], [0], [0], [1], [0, 0, 1, 1], [], []>} : vector<16x16xf32>, vector<16x16xf32>, vector<16x16xf32> -> vector<16x16xf32>
    %cst_36 = arith.constant 2.500000e-01 : f32
    %58 = vector.broadcast %cst_36 : f32 to vector<16x16xf32>
    %59 = arith.mulf %57, %58 : vector<16x16xf32>
    %60 = arith.addf %59, %52 : vector<16x16xf32>
    %cst_37 = arith.constant dense<0xFF800000> : vector<16xf32>
    %61 = vector.multi_reduction <maximumf>, %60, %cst_37 [1] : vector<16x16xf32> to vector<16xf32>
    %62 = vector.shape_cast %61 : vector<16xf32> to vector<16x1xf32>
    %63 = vector.broadcast %62 : vector<16x1xf32> to vector<16x16xf32>
    %64 = arith.subf %60, %63 : vector<16x16xf32>
    %65 = math.exp %64 : vector<16x16xf32>
    %cst_38 = arith.constant dense<0.000000e+00> : vector<16xf32>
    %66 = vector.multi_reduction <add>, %65, %cst_38 [1] : vector<16x16xf32> to vector<16xf32>
    %67 = vector.shape_cast %66 : vector<16xf32> to vector<16x1xf32>
    %68 = tpu.reciprocal %67 {approx = true} : vector<16x1xf32> -> vector<16x1xf32>
    %69 = vector.broadcast %68 : vector<16x1xf32> to vector<16x16xf32>
    %70 = arith.mulf %65, %69 : vector<16x16xf32>
    %cst_39 = arith.constant dense<0.000000e+00> : vector<16x16xf32>
    %71 = tpu.matmul %70, %55, %cst_39 {dimension_numbers = #tpu.dot_dimension_numbers<[1], [0], [0], [1], [0, 0, 1, 1], [], []>} : vector<16x16xf32>, vector<16x16xf32>, vector<16x16xf32> -> vector<16x16xf32>
    %72 = vector.extract_strided_slice %37 {offsets = [0, 16], sizes = [16, 16], strides = [1, 1]} : vector<16x64xf32> to vector<16x16xf32>
    %73 = vector.extract_strided_slice %44 {offsets = [0, 16], sizes = [16, 16], strides = [1, 1]} : vector<16x64xf32> to vector<16x16xf32>
    %74 = vector.extract_strided_slice %51 {offsets = [0, 16], sizes = [16, 16], strides = [1, 1]} : vector<16x64xf32> to vector<16x16xf32>
    %75 = tpu.transpose %73, [1, 0] : vector<16x16xf32> -> vector<16x16xf32>
    %cst_40 = arith.constant dense<0.000000e+00> : vector<16x16xf32>
    %76 = tpu.matmul %72, %75, %cst_40 {dimension_numbers = #tpu.dot_dimension_numbers<[1], [0], [0], [1], [0, 0, 1, 1], [], []>} : vector<16x16xf32>, vector<16x16xf32>, vector<16x16xf32> -> vector<16x16xf32>
    %cst_41 = arith.constant 2.500000e-01 : f32
    %77 = vector.broadcast %cst_41 : f32 to vector<16x16xf32>
    %78 = arith.mulf %76, %77 : vector<16x16xf32>
    %79 = arith.addf %78, %52 : vector<16x16xf32>
    %cst_42 = arith.constant dense<0xFF800000> : vector<16xf32>
    %80 = vector.multi_reduction <maximumf>, %79, %cst_42 [1] : vector<16x16xf32> to vector<16xf32>
    %81 = vector.shape_cast %80 : vector<16xf32> to vector<16x1xf32>
    %82 = vector.broadcast %81 : vector<16x1xf32> to vector<16x16xf32>
    %83 = arith.subf %79, %82 : vector<16x16xf32>
    %84 = math.exp %83 : vector<16x16xf32>
    %cst_43 = arith.constant dense<0.000000e+00> : vector<16xf32>
    %85 = vector.multi_reduction <add>, %84, %cst_43 [1] : vector<16x16xf32> to vector<16xf32>
    %86 = vector.shape_cast %85 : vector<16xf32> to vector<16x1xf32>
    %87 = tpu.reciprocal %86 {approx = true} : vector<16x1xf32> -> vector<16x1xf32>
    %88 = vector.broadcast %87 : vector<16x1xf32> to vector<16x16xf32>
    %89 = arith.mulf %84, %88 : vector<16x16xf32>
    %cst_44 = arith.constant dense<0.000000e+00> : vector<16x16xf32>
    %90 = tpu.matmul %89, %74, %cst_44 {dimension_numbers = #tpu.dot_dimension_numbers<[1], [0], [0], [1], [0, 0, 1, 1], [], []>} : vector<16x16xf32>, vector<16x16xf32>, vector<16x16xf32> -> vector<16x16xf32>
    %91 = vector.extract_strided_slice %37 {offsets = [0, 32], sizes = [16, 16], strides = [1, 1]} : vector<16x64xf32> to vector<16x16xf32>
    %92 = vector.extract_strided_slice %44 {offsets = [0, 32], sizes = [16, 16], strides = [1, 1]} : vector<16x64xf32> to vector<16x16xf32>
    %93 = vector.extract_strided_slice %51 {offsets = [0, 32], sizes = [16, 16], strides = [1, 1]} : vector<16x64xf32> to vector<16x16xf32>
    %94 = tpu.transpose %92, [1, 0] : vector<16x16xf32> -> vector<16x16xf32>
    %cst_45 = arith.constant dense<0.000000e+00> : vector<16x16xf32>
    %95 = tpu.matmul %91, %94, %cst_45 {dimension_numbers = #tpu.dot_dimension_numbers<[1], [0], [0], [1], [0, 0, 1, 1], [], []>} : vector<16x16xf32>, vector<16x16xf32>, vector<16x16xf32> -> vector<16x16xf32>
    %cst_46 = arith.constant 2.500000e-01 : f32
    %96 = vector.broadcast %cst_46 : f32 to vector<16x16xf32>
    %97 = arith.mulf %95, %96 : vector<16x16xf32>
    %98 = arith.addf %97, %52 : vector<16x16xf32>
    %cst_47 = arith.constant dense<0xFF800000> : vector<16xf32>
    %99 = vector.multi_reduction <maximumf>, %98, %cst_47 [1] : vector<16x16xf32> to vector<16xf32>
    %100 = vector.shape_cast %99 : vector<16xf32> to vector<16x1xf32>
    %101 = vector.broadcast %100 : vector<16x1xf32> to vector<16x16xf32>
    %102 = arith.subf %98, %101 : vector<16x16xf32>
    %103 = math.exp %102 : vector<16x16xf32>
    %cst_48 = arith.constant dense<0.000000e+00> : vector<16xf32>
    %104 = vector.multi_reduction <add>, %103, %cst_48 [1] : vector<16x16xf32> to vector<16xf32>
    %105 = vector.shape_cast %104 : vector<16xf32> to vector<16x1xf32>
    %106 = tpu.reciprocal %105 {approx = true} : vector<16x1xf32> -> vector<16x1xf32>
    %107 = vector.broadcast %106 : vector<16x1xf32> to vector<16x16xf32>
    %108 = arith.mulf %103, %107 : vector<16x16xf32>
    %cst_49 = arith.constant dense<0.000000e+00> : vector<16x16xf32>
    %109 = tpu.matmul %108, %93, %cst_49 {dimension_numbers = #tpu.dot_dimension_numbers<[1], [0], [0], [1], [0, 0, 1, 1], [], []>} : vector<16x16xf32>, vector<16x16xf32>, vector<16x16xf32> -> vector<16x16xf32>
    %110 = vector.extract_strided_slice %37 {offsets = [0, 48], sizes = [16, 16], strides = [1, 1]} : vector<16x64xf32> to vector<16x16xf32>
    %111 = vector.extract_strided_slice %44 {offsets = [0, 48], sizes = [16, 16], strides = [1, 1]} : vector<16x64xf32> to vector<16x16xf32>
    %112 = vector.extract_strided_slice %51 {offsets = [0, 48], sizes = [16, 16], strides = [1, 1]} : vector<16x64xf32> to vector<16x16xf32>
    %113 = tpu.transpose %111, [1, 0] : vector<16x16xf32> -> vector<16x16xf32>
    %cst_50 = arith.constant dense<0.000000e+00> : vector<16x16xf32>
    %114 = tpu.matmul %110, %113, %cst_50 {dimension_numbers = #tpu.dot_dimension_numbers<[1], [0], [0], [1], [0, 0, 1, 1], [], []>} : vector<16x16xf32>, vector<16x16xf32>, vector<16x16xf32> -> vector<16x16xf32>
    %cst_51 = arith.constant 2.500000e-01 : f32
    %115 = vector.broadcast %cst_51 : f32 to vector<16x16xf32>
    %116 = arith.mulf %114, %115 : vector<16x16xf32>
    %117 = arith.addf %116, %52 : vector<16x16xf32>
    %cst_52 = arith.constant dense<0xFF800000> : vector<16xf32>
    %118 = vector.multi_reduction <maximumf>, %117, %cst_52 [1] : vector<16x16xf32> to vector<16xf32>
    %119 = vector.shape_cast %118 : vector<16xf32> to vector<16x1xf32>
    %120 = vector.broadcast %119 : vector<16x1xf32> to vector<16x16xf32>
    %121 = arith.subf %117, %120 : vector<16x16xf32>
    %122 = math.exp %121 : vector<16x16xf32>
    %cst_53 = arith.constant dense<0.000000e+00> : vector<16xf32>
    %123 = vector.multi_reduction <add>, %122, %cst_53 [1] : vector<16x16xf32> to vector<16xf32>
    %124 = vector.shape_cast %123 : vector<16xf32> to vector<16x1xf32>
    %125 = tpu.reciprocal %124 {approx = true} : vector<16x1xf32> -> vector<16x1xf32>
    %126 = vector.broadcast %125 : vector<16x1xf32> to vector<16x16xf32>
    %127 = arith.mulf %122, %126 : vector<16x16xf32>
    %cst_54 = arith.constant dense<0.000000e+00> : vector<16x16xf32>
    %128 = tpu.matmul %127, %112, %cst_54 {dimension_numbers = #tpu.dot_dimension_numbers<[1], [0], [0], [1], [0, 0, 1, 1], [], []>} : vector<16x16xf32>, vector<16x16xf32>, vector<16x16xf32> -> vector<16x16xf32>
    %129 = tpu.concatenate %71, %90, %109, %128 in 1 : vector<16x16xf32>, vector<16x16xf32>, vector<16x16xf32>, vector<16x16xf32> -> vector<16x64xf32>
    %130 = arith.truncf %129 : vector<16x64xf32> to vector<16x64xbf16>
    %c0_55 = arith.constant 0 : index
    %c0_56 = arith.constant 0 : index
    %c0_57 = arith.constant 0 : index
    %131 = vector.load %arg12[%c0_55, %c0_56, %c0_57] : memref<1x64x64xbf16, #tpu.memory_space<vmem>>, vector<1x64x64xbf16>
    %132 = vector.shape_cast %131 : vector<1x64x64xbf16> to vector<64x64xbf16>
    %cst_58 = arith.constant dense<0.000000e+00> : vector<16x64xf32>
    %133 = tpu.matmul %130, %132, %cst_58 {dimension_numbers = #tpu.dot_dimension_numbers<[1], [0], [0], [1], [0, 0, 1, 1], [], []>} : vector<16x64xbf16>, vector<64x64xbf16>, vector<16x64xf32> -> vector<16x64xf32>
    %c0_59 = arith.constant 0 : index
    %c0_60 = arith.constant 0 : index
    %c0_61 = arith.constant 0 : index
    %134 = vector.load %arg13[%c0_59, %c0_60, %c0_61] : memref<1x1x64xf32, #tpu.memory_space<vmem>>, vector<1x1x64xf32>
    %135 = vector.shape_cast %134 : vector<1x1x64xf32> to vector<1x64xf32>
    %136 = vector.broadcast %135 : vector<1x64xf32> to vector<16x64xf32>
    %137 = arith.addf %133, %136 : vector<16x64xf32>
    %138 = arith.addf %3, %137 : vector<16x64xf32>
    %c0_62 = arith.constant 0 : index
    %c0_63 = arith.constant 0 : index
    %c0_64 = arith.constant 0 : index
    %139 = vector.load %arg14[%c0_62, %c0_63, %c0_64] : memref<1x1x64xf32, #tpu.memory_space<vmem>>, vector<1x1x64xf32>
    %140 = vector.shape_cast %139 : vector<1x1x64xf32> to vector<1x64xf32>
    %c0_65 = arith.constant 0 : index
    %c0_66 = arith.constant 0 : index
    %c0_67 = arith.constant 0 : index
    %141 = vector.load %arg15[%c0_65, %c0_66, %c0_67] : memref<1x1x64xf32, #tpu.memory_space<vmem>>, vector<1x1x64xf32>
    %142 = vector.shape_cast %141 : vector<1x1x64xf32> to vector<1x64xf32>
    %cst_68 = arith.constant dense<0.000000e+00> : vector<16xf32>
    %143 = vector.multi_reduction <add>, %138, %cst_68 [1] : vector<16x64xf32> to vector<16xf32>
    %144 = vector.shape_cast %143 : vector<16xf32> to vector<16x1xf32>
    %cst_69 = arith.constant 6.400000e+01 : f32
    %145 = vector.broadcast %cst_69 : f32 to vector<16x1xf32>
    %146 = arith.divf %144, %145 : vector<16x1xf32>
    %147 = vector.broadcast %146 : vector<16x1xf32> to vector<16x64xf32>
    %148 = arith.subf %138, %147 : vector<16x64xf32>
    %149 = arith.mulf %148, %148 : vector<16x64xf32>
    %cst_70 = arith.constant dense<0.000000e+00> : vector<16xf32>
    %150 = vector.multi_reduction <add>, %149, %cst_70 [1] : vector<16x64xf32> to vector<16xf32>
    %151 = vector.shape_cast %150 : vector<16xf32> to vector<16x1xf32>
    %cst_71 = arith.constant 6.400000e+01 : f32
    %152 = vector.broadcast %cst_71 : f32 to vector<16x1xf32>
    %153 = arith.divf %151, %152 : vector<16x1xf32>
    %154 = vector.broadcast %146 : vector<16x1xf32> to vector<16x64xf32>
    %155 = arith.subf %138, %154 : vector<16x64xf32>
    %cst_72 = arith.constant 9.99999974E-6 : f32
    %156 = vector.broadcast %cst_72 : f32 to vector<16x1xf32>
    %157 = arith.addf %153, %156 : vector<16x1xf32>
    %158 = math.rsqrt %157 : vector<16x1xf32>
    %159 = vector.broadcast %158 : vector<16x1xf32> to vector<16x64xf32>
    %160 = arith.mulf %155, %159 : vector<16x64xf32>
    %161 = vector.broadcast %140 : vector<1x64xf32> to vector<16x64xf32>
    %162 = arith.mulf %160, %161 : vector<16x64xf32>
    %163 = vector.broadcast %142 : vector<1x64xf32> to vector<16x64xf32>
    %164 = arith.addf %162, %163 : vector<16x64xf32>
    %165 = arith.truncf %164 : vector<16x64xf32> to vector<16x64xbf16>
    %c0_73 = arith.constant 0 : index
    %c0_74 = arith.constant 0 : index
    %c0_75 = arith.constant 0 : index
    %166 = vector.load %arg16[%c0_73, %c0_74, %c0_75] : memref<1x64x256xbf16, #tpu.memory_space<vmem>>, vector<1x64x256xbf16>
    %167 = vector.shape_cast %166 : vector<1x64x256xbf16> to vector<64x256xbf16>
    %cst_76 = arith.constant dense<0.000000e+00> : vector<16x256xf32>
    %168 = tpu.matmul %165, %167, %cst_76 {dimension_numbers = #tpu.dot_dimension_numbers<[1], [0], [0], [1], [0, 0, 1, 1], [], []>} : vector<16x64xbf16>, vector<64x256xbf16>, vector<16x256xf32> -> vector<16x256xf32>
    %c0_77 = arith.constant 0 : index
    %c0_78 = arith.constant 0 : index
    %c0_79 = arith.constant 0 : index
    %169 = vector.load %arg17[%c0_77, %c0_78, %c0_79] : memref<1x1x256xf32, #tpu.memory_space<vmem>>, vector<1x1x256xf32>
    %170 = vector.shape_cast %169 : vector<1x1x256xf32> to vector<1x256xf32>
    %171 = vector.broadcast %170 : vector<1x256xf32> to vector<16x256xf32>
    %172 = arith.addf %168, %171 : vector<16x256xf32>
    %cst_80 = arith.constant 1.702000e+00 : f32
    %173 = vector.broadcast %cst_80 : f32 to vector<16x256xf32>
    %174 = arith.mulf %173, %172 : vector<16x256xf32>
    %175 = arith.negf %174 : vector<16x256xf32>
    %176 = math.exp %175 : vector<16x256xf32>
    %cst_81 = arith.constant 1.000000e+00 : f32
    %177 = vector.broadcast %cst_81 : f32 to vector<16x256xf32>
    %178 = arith.addf %177, %176 : vector<16x256xf32>
    %179 = arith.divf %177, %178 : vector<16x256xf32>
    %180 = arith.mulf %172, %179 : vector<16x256xf32>
    %181 = arith.truncf %180 : vector<16x256xf32> to vector<16x256xbf16>
    %c0_82 = arith.constant 0 : index
    %c0_83 = arith.constant 0 : index
    %c0_84 = arith.constant 0 : index
    %182 = vector.load %arg18[%c0_82, %c0_83, %c0_84] : memref<1x256x64xbf16, #tpu.memory_space<vmem>>, vector<1x256x64xbf16>
    %183 = vector.shape_cast %182 : vector<1x256x64xbf16> to vector<256x64xbf16>
    %cst_85 = arith.constant dense<0.000000e+00> : vector<16x64xf32>
    %184 = tpu.matmul %181, %183, %cst_85 {dimension_numbers = #tpu.dot_dimension_numbers<[1], [0], [0], [1], [0, 0, 1, 1], [], []>} : vector<16x256xbf16>, vector<256x64xbf16>, vector<16x64xf32> -> vector<16x64xf32>
    %c0_86 = arith.constant 0 : index
    %c0_87 = arith.constant 0 : index
    %c0_88 = arith.constant 0 : index
    %185 = vector.load %arg19[%c0_86, %c0_87, %c0_88] : memref<1x1x64xf32, #tpu.memory_space<vmem>>, vector<1x1x64xf32>
    %186 = vector.shape_cast %185 : vector<1x1x64xf32> to vector<1x64xf32>
    %187 = vector.broadcast %186 : vector<1x64xf32> to vector<16x64xf32>
    %188 = arith.addf %184, %187 : vector<16x64xf32>
    %189 = arith.addf %138, %188 : vector<16x64xf32>
    %c0_89 = arith.constant 0 : index
    %c0_90 = arith.constant 0 : index
    %190 = vector.load %arg24[%c0_89, %c0_90] : memref<16x64xf32, #tpu.memory_space<vmem>>, vector<16x64xf32>
    tpu.vector_store %arg24[%c0_89, %c0_90], %189 {strides = array<i32>} : memref<16x64xf32, #tpu.memory_space<vmem>>, vector<16x64xf32>,
    %c1_i32 = arith.constant 1 : i32
    %191 = arith.cmpi eq, %arg0, %c1_i32 : i32
    %192 = arith.extui %191 : i1 to i32
    %c0_i32_91 = arith.constant 0 : i32
    %193 = arith.cmpi ne, %192, %c0_i32_91 : i32
    scf.if %193 {
      %c0_92 = arith.constant 0 : index
      %194 = memref.load %arg1[%c0_92] : memref<2xi32, #tpu.memory_space<smem>>
      %195 = arith.index_cast %194 : i32 to index
      %c0_93 = arith.constant 0 : index
      %196 = vector.load %arg24[%195, %c0_93] : memref<16x64xf32, #tpu.memory_space<vmem>>, vector<1x64xf32>
      %c1 = arith.constant 1 : index
      %197 = memref.load %arg1[%c1] : memref<2xi32, #tpu.memory_space<smem>>
      %198 = arith.index_cast %197 : i32 to index
      %c0_94 = arith.constant 0 : index
      %199 = vector.load %arg24[%198, %c0_94] : memref<16x64xf32, #tpu.memory_space<vmem>>, vector<1x64xf32>
      %200 = tpu.concatenate %196, %199 in 0 : vector<1x64xf32>, vector<1x64xf32> -> vector<2x64xf32>
      %c0_95 = arith.constant 0 : index
      %c0_96 = arith.constant 0 : index
      %201 = vector.load %arg20[%c0_95, %c0_96] : memref<1x64xf32, #tpu.memory_space<vmem>>, vector<1x64xf32>
      %c0_97 = arith.constant 0 : index
      %c0_98 = arith.constant 0 : index
      %202 = vector.load %arg21[%c0_97, %c0_98] : memref<1x64xf32, #tpu.memory_space<vmem>>, vector<1x64xf32>
      %cst_99 = arith.constant dense<0.000000e+00> : vector<2xf32>
      %203 = vector.multi_reduction <add>, %200, %cst_99 [1] : vector<2x64xf32> to vector<2xf32>
      %204 = vector.shape_cast %203 : vector<2xf32> to vector<2x1xf32>
      %cst_100 = arith.constant 6.400000e+01 : f32
      %205 = vector.broadcast %cst_100 : f32 to vector<2x1xf32>
      %206 = arith.divf %204, %205 : vector<2x1xf32>
      %207 = vector.broadcast %206 : vector<2x1xf32> to vector<2x64xf32>
      %208 = arith.subf %200, %207 : vector<2x64xf32>
      %209 = arith.mulf %208, %208 : vector<2x64xf32>
      %cst_101 = arith.constant dense<0.000000e+00> : vector<2xf32>
      %210 = vector.multi_reduction <add>, %209, %cst_101 [1] : vector<2x64xf32> to vector<2xf32>
      %211 = vector.shape_cast %210 : vector<2xf32> to vector<2x1xf32>
      %cst_102 = arith.constant 6.400000e+01 : f32
      %212 = vector.broadcast %cst_102 : f32 to vector<2x1xf32>
      %213 = arith.divf %211, %212 : vector<2x1xf32>
      %214 = vector.broadcast %206 : vector<2x1xf32> to vector<2x64xf32>
      %215 = arith.subf %200, %214 : vector<2x64xf32>
      %cst_103 = arith.constant 9.99999974E-6 : f32
      %216 = vector.broadcast %cst_103 : f32 to vector<2x1xf32>
      %217 = arith.addf %213, %216 : vector<2x1xf32>
      %218 = math.rsqrt %217 : vector<2x1xf32>
      %219 = vector.broadcast %218 : vector<2x1xf32> to vector<2x64xf32>
      %220 = arith.mulf %215, %219 : vector<2x64xf32>
      %221 = vector.broadcast %201 : vector<1x64xf32> to vector<2x64xf32>
      %222 = arith.mulf %220, %221 : vector<2x64xf32>
      %223 = vector.broadcast %202 : vector<1x64xf32> to vector<2x64xf32>
      %224 = arith.addf %222, %223 : vector<2x64xf32>
      %225 = arith.truncf %224 : vector<2x64xf32> to vector<2x64xbf16>
      %c0_104 = arith.constant 0 : index
      %c0_105 = arith.constant 0 : index
      %226 = vector.load %arg22[%c0_104, %c0_105] : memref<64x32xbf16, #tpu.memory_space<vmem>>, vector<64x32xbf16>
      %cst_106 = arith.constant dense<0.000000e+00> : vector<2x32xf32>
      %227 = tpu.matmul %225, %226, %cst_106 {dimension_numbers = #tpu.dot_dimension_numbers<[1], [0], [0], [1], [0, 0, 1, 1], [], []>} : vector<2x64xbf16>, vector<64x32xbf16>, vector<2x32xf32> -> vector<2x32xf32>
      %c0_107 = arith.constant 0 : index
      %c0_108 = arith.constant 0 : index
      %228 = vector.load %arg23[%c0_107, %c0_108] : memref<2x32xf32, #tpu.memory_space<vmem>>, vector<2x32xf32>
      tpu.vector_store %arg23[%c0_107, %c0_108], %227 {strides = array<i32>} : memref<2x32xf32, #tpu.memory_space<vmem>>, vector<2x32xf32>,
    } else {
    }
    return
  }
  func.func @transform_0(%arg0: i32, %arg1: memref<2xi32, #tpu.memory_space<smem>>) -> (i32, i32) {
    %c0_i32 = arith.constant 0 : i32
    %c0_i32_0 = arith.constant 0 : i32
    %c0_i32_1 = arith.constant 0 : i32
    return %c0_i32, %c0_i32_0 : i32, i32
  }
  func.func @transform_1(%arg0: i32, %arg1: memref<2xi32, #tpu.memory_space<smem>>) -> (i32, i32) {
    %c0_i32 = arith.constant 0 : i32
    %c0_i32_0 = arith.constant 0 : i32
    %c0_i32_1 = arith.constant 0 : i32
    return %c0_i32, %c0_i32_0 : i32, i32
  }
  func.func @transform_2(%arg0: i32, %arg1: memref<2xi32, #tpu.memory_space<smem>>) -> (i32, i32, i32) {
    %c0_i32 = arith.constant 0 : i32
    %c0_i32_0 = arith.constant 0 : i32
    %c0_i32_1 = arith.constant 0 : i32
    return %arg0, %c0_i32, %c0_i32_0 : i32, i32, i32
  }
  func.func @transform_3(%arg0: i32, %arg1: memref<2xi32, #tpu.memory_space<smem>>) -> (i32, i32, i32) {
    %c0_i32 = arith.constant 0 : i32
    %c0_i32_0 = arith.constant 0 : i32
    %c0_i32_1 = arith.constant 0 : i32
    return %arg0, %c0_i32, %c0_i32_0 : i32, i32, i32
  }
  func.func @transform_4(%arg0: i32, %arg1: memref<2xi32, #tpu.memory_space<smem>>) -> (i32, i32, i32) {
    %c0_i32 = arith.constant 0 : i32
    %c0_i32_0 = arith.constant 0 : i32
    %c0_i32_1 = arith.constant 0 : i32
    return %arg0, %c0_i32, %c0_i32_0 : i32, i32, i32
  }
  func.func @transform_5(%arg0: i32, %arg1: memref<2xi32, #tpu.memory_space<smem>>) -> (i32, i32, i32) {
    %c0_i32 = arith.constant 0 : i32
    %c0_i32_0 = arith.constant 0 : i32
    %c0_i32_1 = arith.constant 0 : i32
    return %arg0, %c0_i32, %c0_i32_0 : i32, i32, i32
  }
  func.func @transform_6(%arg0: i32, %arg1: memref<2xi32, #tpu.memory_space<smem>>) -> (i32, i32, i32) {
    %c0_i32 = arith.constant 0 : i32
    %c0_i32_0 = arith.constant 0 : i32
    %c0_i32_1 = arith.constant 0 : i32
    return %arg0, %c0_i32, %c0_i32_0 : i32, i32, i32
  }
  func.func @transform_7(%arg0: i32, %arg1: memref<2xi32, #tpu.memory_space<smem>>) -> (i32, i32, i32) {
    %c0_i32 = arith.constant 0 : i32
    %c0_i32_0 = arith.constant 0 : i32
    %c0_i32_1 = arith.constant 0 : i32
    return %arg0, %c0_i32, %c0_i32_0 : i32, i32, i32
  }
  func.func @transform_8(%arg0: i32, %arg1: memref<2xi32, #tpu.memory_space<smem>>) -> (i32, i32, i32) {
    %c0_i32 = arith.constant 0 : i32
    %c0_i32_0 = arith.constant 0 : i32
    %c0_i32_1 = arith.constant 0 : i32
    return %arg0, %c0_i32, %c0_i32_0 : i32, i32, i32
  }
  func.func @transform_9(%arg0: i32, %arg1: memref<2xi32, #tpu.memory_space<smem>>) -> (i32, i32, i32) {
    %c0_i32 = arith.constant 0 : i32
    %c0_i32_0 = arith.constant 0 : i32
    %c0_i32_1 = arith.constant 0 : i32
    return %arg0, %c0_i32, %c0_i32_0 : i32, i32, i32
  }
  func.func @transform_10(%arg0: i32, %arg1: memref<2xi32, #tpu.memory_space<smem>>) -> (i32, i32, i32) {
    %c0_i32 = arith.constant 0 : i32
    %c0_i32_0 = arith.constant 0 : i32
    %c0_i32_1 = arith.constant 0 : i32
    return %arg0, %c0_i32, %c0_i32_0 : i32, i32, i32
  }
  func.func @transform_11(%arg0: i32, %arg1: memref<2xi32, #tpu.memory_space<smem>>) -> (i32, i32, i32) {
    %c0_i32 = arith.constant 0 : i32
    %c0_i32_0 = arith.constant 0 : i32
    %c0_i32_1 = arith.constant 0 : i32
    return %arg0, %c0_i32, %c0_i32_0 : i32, i32, i32
  }
  func.func @transform_12(%arg0: i32, %arg1: memref<2xi32, #tpu.memory_space<smem>>) -> (i32, i32, i32) {
    %c0_i32 = arith.constant 0 : i32
    %c0_i32_0 = arith.constant 0 : i32
    %c0_i32_1 = arith.constant 0 : i32
    return %arg0, %c0_i32, %c0_i32_0 : i32, i32, i32
  }
  func.func @transform_13(%arg0: i32, %arg1: memref<2xi32, #tpu.memory_space<smem>>) -> (i32, i32, i32) {
    %c0_i32 = arith.constant 0 : i32
    %c0_i32_0 = arith.constant 0 : i32
    %c0_i32_1 = arith.constant 0 : i32
    return %arg0, %c0_i32, %c0_i32_0 : i32, i32, i32
  }
  func.func @transform_14(%arg0: i32, %arg1: memref<2xi32, #tpu.memory_space<smem>>) -> (i32, i32, i32) {
    %c0_i32 = arith.constant 0 : i32
    %c0_i32_0 = arith.constant 0 : i32
    %c0_i32_1 = arith.constant 0 : i32
    return %arg0, %c0_i32, %c0_i32_0 : i32, i32, i32
  }
  func.func @transform_15(%arg0: i32, %arg1: memref<2xi32, #tpu.memory_space<smem>>) -> (i32, i32, i32) {
    %c0_i32 = arith.constant 0 : i32
    %c0_i32_0 = arith.constant 0 : i32
    %c0_i32_1 = arith.constant 0 : i32
    return %arg0, %c0_i32, %c0_i32_0 : i32, i32, i32
  }
  func.func @transform_16(%arg0: i32, %arg1: memref<2xi32, #tpu.memory_space<smem>>) -> (i32, i32, i32) {
    %c0_i32 = arith.constant 0 : i32
    %c0_i32_0 = arith.constant 0 : i32
    %c0_i32_1 = arith.constant 0 : i32
    return %arg0, %c0_i32, %c0_i32_0 : i32, i32, i32
  }
  func.func @transform_17(%arg0: i32, %arg1: memref<2xi32, #tpu.memory_space<smem>>) -> (i32, i32, i32) {
    %c0_i32 = arith.constant 0 : i32
    %c0_i32_0 = arith.constant 0 : i32
    %c0_i32_1 = arith.constant 0 : i32
    return %arg0, %c0_i32, %c0_i32_0 : i32, i32, i32
  }
  func.func @transform_18(%arg0: i32, %arg1: memref<2xi32, #tpu.memory_space<smem>>) -> (i32, i32) {
    %c0_i32 = arith.constant 0 : i32
    %c0_i32_0 = arith.constant 0 : i32
    %c0_i32_1 = arith.constant 0 : i32
    return %c0_i32, %c0_i32_0 : i32, i32
  }
  func.func @transform_19(%arg0: i32, %arg1: memref<2xi32, #tpu.memory_space<smem>>) -> (i32, i32) {
    %c0_i32 = arith.constant 0 : i32
    %c0_i32_0 = arith.constant 0 : i32
    %c0_i32_1 = arith.constant 0 : i32
    return %c0_i32, %c0_i32_0 : i32, i32
  }
  func.func @transform_20(%arg0: i32, %arg1: memref<2xi32, #tpu.memory_space<smem>>) -> (i32, i32) {
    %c0_i32 = arith.constant 0 : i32
    %c0_i32_0 = arith.constant 0 : i32
    %c0_i32_1 = arith.constant 0 : i32
    return %c0_i32, %c0_i32_0 : i32, i32
  }
  func.func @transform_21(%arg0: i32, %arg1: memref<2xi32, #tpu.memory_space<smem>>) -> (i32, i32) {
    %c0_i32 = arith.constant 0 : i32
    %c0_i32_0 = arith.constant 0 : i32
    %c0_i32_1 = arith.constant 0 : i32
    return %c0_i32, %c0_i32_0 : i32, i32
  }
}

</mosaic_0001>

<bundles_post_ra>
// kernel: tpu_custom_call.1
= control target key start
LH: loop header
LB: loop body
LE: loop exit
PB: predicated region body
PF: predicated region fallthrough
CT: control target
= control target key end

     0   :  { %s3934_s0 = inlined_call_operand.hbm [shape: s32[2], index: 0, kind: input, shape index: {}]   ;;  %s3935_s1 = inlined_call_operand.vmem [shape: f32[16,64], index: 1, kind: input, shape index: {}]   ;;  %s3936_s2 = inlined_call_operand.vmem [shape: f32[16,16], index: 2, kind: input, shape index: {}]   ;;  %s3937_s3 = inlined_call_operand.vmem [shape: f32[2,1,64], index: 3, kind: input, shape index: {}]   ;;  %s3938_s4 = inlined_call_operand.vmem [shape: f32[2,1,64], index: 4, kind: input, shape index: {}]   ;;  %s3939_s5 = inlined_call_operand.vmem [shape: bf16[2,64,64], index: 5, kind: input, shape index: {}]   ;;  %s3940_s6 = inlined_call_operand.vmem [shape: f32[2,1,64], index: 6, kind: input, shape index: {}]   ;;  %s3941_s7 = inlined_call_operand.vmem [shape: bf16[2,64,64], index: 7, kind: input, shape index: {}]   ;;  %s3942_s8 = inlined_call_operand.vmem [shape: f32[2,1,64], index: 8, kind: input, shape index: {}]   ;;  %s3943_s9 = inlined_call_operand.vmem [shape: bf16[2,64,64], index: 9, kind: input, shape index: {}]   ;;  %s3944_s10 = inlined_call_operand.vmem [shape: f32[2,1,64], index: 10, kind: input, shape index: {}]   ;;  %s3945_s11 = inlined_call_operand.vmem [shape: bf16[2,64,64], index: 11, kind: input, shape index: {}]   ;;  %s3946_s12 = inlined_call_operand.vmem [shape: f32[2,1,64], index: 12, kind: input, shape index: {}]   ;;  %s3947_s13 = inlined_call_operand.vmem [shape: f32[2,1,64], index: 13, kind: input, shape index: {}]   ;;  %s3948_s14 = inlined_call_operand.vmem [shape: f32[2,1,64], index: 14, kind: input, shape index: {}]   ;;  %s3949_s15 = inlined_call_operand.vmem [shape: bf16[2,64,256], index: 15, kind: input, shape index: {}]   ;;  %s3950_s16 = inlined_call_operand.vmem [shape: f32[2,1,256], index: 16, kind: input, shape index: {}]   ;;  %s3951_s17 = inlined_call_operand.vmem [shape: bf16[2,256,64], index: 17, kind: input, shape index: {}]   ;;  %s3952_s18 = inlined_call_operand.vmem [shape: f32[2,1,64], index: 18, kind: input, shape index: {}]   ;;  %s3953_s19 = inlined_call_operand.vmem [shape: f32[1,64], index: 19, kind: input, shape index: {}]   ;;  %s3954_s20 = inlined_call_operand.vmem [shape: f32[1,64], index: 20, kind: input, shape index: {}]   ;;  %s3955_s21 = inlined_call_operand.vmem [shape: bf16[64,32], index: 21, kind: input, shape index: {}]   ;;  %s3956_s22 = inlined_call_operand.hbm [shape: f32[2,32], index: 22, kind: output, shape index: {}]  }
   0x1   :  { %3963 = sst [smem:[#allocation10_spill]] %s3934_s0 }
   0x2   :  { %3964 = sst [smem:[#allocation11_spill]] %s3935_s1  ;;  %s3978_s29 = sld [smem:[#allocation10_spill]] }
   0x3   :  { %3965 = sst [smem:[#allocation12_spill]] %s3936_s2 }
   0x4   :  { %3966 = sst [smem:[#allocation13_spill]] %s3937_s3 }
   0x5   :  { %3967 = sst [smem:[#allocation14_spill]] %s3938_s4 }
   0x6   :  { %3968 = sst [smem:[#allocation15_spill]] %s3939_s5 }
   0x7   :  { %3969 = sst [smem:[#allocation16_spill]] %s3940_s6 }
   0x8   :  { %3970 = sst [smem:[#allocation17_spill]] %s3941_s7 }
   0x9   :  { %3971 = sst [smem:[#allocation18_spill]] %s3943_s9 }
   0xa   :  { %3972 = sst [smem:[#allocation19_spill]] %s3945_s11 }
   0xb   :  { %3973 = sst [smem:[#allocation20_spill]] %s3950_s16  ;;  %s3343_s16 = scalar_lea.hbm %s3978_s29, 16 }
   0xc   :  { %3974 = sst [smem:[#allocation21_spill]] %s3953_s19  ;;  %p3344_p0 = scmp.ne.s32.totalorder %s3978_s29, %s3343_s16 }
   0xd   :  { %3975 = sst [smem:[#allocation22_spill]] %s3954_s20  ;;  %p3347_p1 = scmp.lt.u32.totalorder %s3343_s16, %s3978_s29 }
   0xe   :  { %3976 = sst [smem:[#allocation23_spill]] %s3955_s21 }
   0xf   :  { %3977 = sst [smem:[#allocation24_spill]] %s3956_s22  ;;  %p3349_p2 = pnand %p3347_p1, %p3344_p0 }
  0x11   :  { %3352 = shalt.err (!%p3349_p2)  }
  0x12   :  { %s3393_s1 = smov [#allocation4]  }
  0x13   :  { %28 = dma.hbm_to_smem %s3978_s29, 16, %s3393_s1, [#allocation3] }
  0x14   :  { %3383 = dma.done.wait [#allocation3], 16 }
  0x15   :  { %3384 = vsyncadd [#allocation3], 4294967280 }
  0x16   :  { %30 = sfence }
  0x17   :  { %31 = vsyncpa [#allocation6], 0  ;;  %s3533_s6 = smov 0  }
  0x18 LB: > { %3979 = sst [smem:[#allocation9_spill]] %s3391_s6  ;;  %s3539_s16 = sadd.s32 4294967295, %s3391_s6   ;;  %s3391_s6 = sphi %s3533_s6, %s37_s6  }
  0x19   : > { %p2814_p3 = scmp.ge.s32.totalorder %s3391_s6, 1  ;;  %p719_p4 = scmp.lt.s32.totalorder %s3391_s6, 3 }
  0x1b   : > { %p720_p5 = pnand %p2814_p3, %p719_p4 }
  0x1c   : > { %p830_p6 = scmp.lt.s32.totalorder (!%p720_p5), %s3539_s16, 1  ;;  %s3983_s6 = sld [smem:[#allocation15_spill]] (!%p720_p5) }
  0x1d   : > { %723 = sbr.rel (%p720_p5) target bundleno = 4157 (0x103d), region = 104  ;;  %s3984_s7 = sld [smem:[#allocation17_spill]] (!%p720_p5) }
  0x1e   : > { %s3985_s9 = sld [smem:[#allocation18_spill]] (!%p720_p5)  ;;  %s3986_s11 = sld [smem:[#allocation19_spill]] (!%p720_p5) }
  0x1f   : > { %p2828_p7 = scmp.ne.s32.totalorder (!%p720_p5), %s3539_s16, 0 }
  0x24   : > { %s3545_s25 = scalar_select %p830_p6, %s3539_s16, 1 }
  0x25   : > { %s3988_s5 = sld [smem:[#allocation11_spill]] (!%p2828_p7)  ;;  %vm898_vm0 = vcmask (!%p2828_p7), 523264  }
  0x26   : > { %s2924_s0 = sshll.u32 %s3545_s25, 5  ;;  %s870_s29 = scalar_lea.vmem %s3947_s13, %s3545_s25 }
  0x27   : > { %s3563_s22 = scalar_lea.vmem %s3983_s6, %s2924_s0  ;;  %s3568_s27 = scalar_lea.vmem %s3984_s7, %s2924_s0 }
  0x28   : > { %s3577_s23 = scalar_lea.vmem %s3985_s9, %s2924_s0  ;;  %s3586_s24 = scalar_lea.vmem %s3986_s11, %s2924_s0 }
  0x29   : > { %s2928_s21 = sshll.u32 %s3545_s25, 6  ;;  %s2825_s0 = sshll.u32 %s3545_s25, 1 }
  0x2a   : > { %s3604_s26 = scalar_lea.vmem %s3949_s15, %s2928_s21  ;;  %s3987_s11 = sld [smem:[#allocation20_spill]] }
  0x2b   : > { %s2929_s20 = sshll.u32 %s3545_s25, 7  ;;  %s890_s9 = scalar_lea.vmem %s3952_s18, %s3545_s25  ;;  %v896_v0 = vld [vmem:[%s3988_s5] sm:$0xff] (!%p2828_p7)  ;;  %v897_v1 = vld [vmem:[%s3988_s5 + $0x8] sm:$0xff] (!%p2828_p7) }
  0x2c   : > { %s3616_s28 = scalar_lea.vmem %s3951_s17, %s2929_s20  ;;  %895 = sbr.rel (%p2828_p7) target bundleno = 51 (0x33), region = 108  ;;  %899 = vst.msk [vmem:[#allocation2] sm:$0xff] (!%p2828_p7), %vm898_vm0, %v896_v0  ;;  %900 = vst.msk [vmem:[#allocation2 + $0x8] sm:$0xff] (!%p2828_p7), %vm898_vm0, %v897_v1 }
  0x30   : > { %s3610_s19 = scalar_lea.vmem %s3987_s11, %s2825_s0 }
  0x33 PF: > { %v3629_v2 = vld [vmem:[#allocation2] sm:$0xff]  ;;  %vm905_vm1 = vcmask 523264   ;;  %v3631_v3 = vld [vmem:[#allocation2 + $0x8] sm:$0xff]  ;;  %v3394_v17 = vmov 0.0   ;;  %v3239_v19 = vld [vmem:[%s3563_s22 + $0x10] sm:$0xff]   ;;  %vm3395_vm2 = vmmov 0   ;;  %s3995_s7 = scalar_lea.vmem %s3942_s8, %s3545_s25 }
  0x34   : > { %v906_v4 = vsel %vm905_vm1, %v3629_v2, 0.0  ;;  %v909_v5 = vsel %vm905_vm1, %v3631_v3, 0.0  ;;  %v3237_v16 = vld [vmem:[%s3563_s22] sm:$0xff]   ;;  %3009 = vmatprep.subr.bf16.mxu0 %v3394_v17  ;;  %v3238_v18 = vld [vmem:[%s3563_s22 + $0x8] sm:$0xff]   ;;  %v3240_v20 = vld [vmem:[%s3563_s22 + $0x18] sm:$0xff]   ;;  %3017 = vmatprep.mubr.msk.bf16.mxu0 %vm3395_vm2, %v3394_v17  ;;  %s3989_s6 = sld [smem:[#allocation13_spill]] }
  0x35   : > { %907 = vadd.xlane.f32.xlu0 %v906_v4  ;;  %3010 = vmatpush3.bf16.msra.mxu0 %v3237_v16  ;;  %s3991_s4 = sld [smem:[#allocation14_spill]]  ;;  %v3241_v37 = vld [vmem:[%s3568_s27] sm:$0xff]   ;;  %v3242_v39 = vld [vmem:[%s3568_s27 + $0x8] sm:$0xff]   ;;  %v3243_v40 = vld [vmem:[%s3568_s27 + $0x10] sm:$0xff]   ;;  %s3993_s1 = sld [smem:[#allocation16_spill]]  ;;  %vm1195_vm3 = vcmask 130048  }
  0x36   : > { %3011 = vmatprep.subr.bf16.mxu0 %v3394_v17  ;;  %v3244_v41 = vld [vmem:[%s3568_s27 + $0x18] sm:$0xff]   ;;  %v3245_v42 = vld [vmem:[%s3577_s23] sm:$0xff]   ;;  %v3246_v43 = vld [vmem:[%s3577_s23 + $0x8] sm:$0xff]   ;;  %s3396_s21 = smov 112   ;;  %s3400_s0 = smov 16   ;;  %vm2030_vm5 = vcmask 261120  }
  0x37   : > { %v3247_v44 = vld [vmem:[%s3577_s23 + $0x10] sm:$0xff]   ;;  %v3248_v45 = vld [vmem:[%s3577_s23 + $0x18] sm:$0xff]   ;;  %v2837_v52 = vld [vmem:[%s3995_s7] ss:$0 sm:$0xff]  ;;  %s3399_s23 = smov 32   ;;  %s3401_s7 = smov 48  }
  0x38   : > { %vm3700_vm4 = vmpackc.low %vm1195_vm3, %vm1195_vm3  ;;  %vm2033_vm6 = vcmask 392192   ;;  %p2911_p8 = scmp.ne.s32.totalorder %s3539_s16, 1 }
  0x39   : > { %910 = vadd.xlane.f32.xlu0 %v909_v5  ;;  %3012 = vmatpush3.bf16.msra.mxu0 %v3238_v18  ;;  %vm2500_vm7 = vcmask (!%p2911_p8), 1040384   ;;  %vm2504_vm8 = vcmask (!%p2911_p8), 517120   ;;  %vm3404_vm9 = vmmov (!%p2911_p8), 0   ;;  %s4003_s20 = sld [smem:[#allocation21_spill]] (!%p2911_p8)  ;;  %vm2608_vm10 = vcmask (!%p2911_p8), 254976  }
  0x3a   : > { %3013 = vmatprep.subr.bf16.mxu0 %v3394_v17  ;;  %s3990_s2 = scalar_lea.vmem %s3989_s6, %s3545_s25  ;;  %s4000_s6 = scalar_lea.vmem %s3946_s12, %s3545_s25 }
  0x3b   : > { %v2829_v29 = vld [vmem:[%s3990_s2] ss:$0 sm:$0xff]  ;;  %s3992_s30 = scalar_lea.vmem %s3991_s4, %s3545_s25  ;;  %s3994_s11 = scalar_lea.vmem %s3993_s1, %s3545_s25 }
  0x3c   : > { %v2830_v33 = vld [vmem:[%s3992_s30] ss:$0 sm:$0xff]  ;;  %s3998_s2 = scalar_lea.vmem %s3944_s10, %s3545_s25  ;;  %s3999_s4 = sld [smem:[#allocation12_spill]] }
  0x3d   : > { %3014 = vmatpush3.bf16.msra.mxu0 %v3239_v19  ;;  %v2831_v46 = vld [vmem:[%s3994_s11] ss:$0 sm:$0xff]  ;;  %s3397_s1 = smov 96   ;;  %s3398_s11 = smov 80  }
  0x3e   : > { %3015 = vmatprep.subr.bf16.mxu0 %v3394_v17  ;;  %v2843_v63 = vld [vmem:[%s3998_s2] ss:$0 sm:$0xff]  ;;  %s4001_s30 = scalar_lea.vmem %s3948_s14, %s3545_s25  ;;  %s2491_s25 = sld [smem:[#allocation4]] (!%p2911_p8) }
  0x41   : > { %3016 = vmatpush3.bf16.msra.mxu0 %v3240_v20 }
  0x42   : > { %3021 = vmatprep.subr.bf16.mxu0 %v3394_v17 }
  0xc2   : > { %v908_v6 = vpop.xlane.xlu0 %907 }
  0xc3   : > { %v913_v7 = vmul.f32 0.015625, %v908_v6 }
  0xc5   : > { %v915_v8 = vsub.f32 %v3629_v2, %v913_v7 }
  0xc6   : > { %v911_v9 = vpop.xlane.xlu0 %910 }
  0xc7   : > { %v914_v10 = vmul.f32 0.015625, %v911_v9  ;;  %v917_v11 = vmul.f32 %v915_v8, %v915_v8 }
  0xc9   : > { %v916_v12 = vsub.f32 %v3631_v3, %v914_v10  ;;  %v919_v13 = vsel %vm905_vm1, %v917_v11, 0.0  ;;  %v3724_v11 = vld [vmem:[%s3999_s4 + $0x8] sm:$0xff] }
  0xca   : > { %920 = vadd.xlane.f32.xlu1 %v919_v13 }
  0xcb   : > { %v918_v14 = vmul.f32 %v916_v12, %v916_v12 }
  0xcd   : > { %v922_v15 = vsel %vm905_vm1, %v918_v14, 0.0  ;;  %v3729_v14 = vld [vmem:[%s3999_s4] sm:$0xff] }
  0xce   : > { %923 = vadd.xlane.f32.xlu1 %v922_v15 }
 0x157   : > { %v921_v21 = vpop.xlane.xlu1 %920 }
 0x158   : > { %v925_v22 = vmul.f32 0.015625, %v921_v21 }
 0x15a   : > { %v927_v23 = vadd.f32 1e-05, %v925_v22 }
 0x15b   : > { %v924_v24 = vpop.xlane.xlu1 %923 }
 0x15c   : > { %3281 = vrsqrt.f32 %v927_v23  ;;  %v926_v25 = vmul.f32 0.015625, %v924_v24 }
 0x15e   : > { %v928_v26 = vadd.f32 1e-05, %v926_v25 }
 0x160   : > { %3283 = vrsqrt.f32 %v928_v26 }
 0x166   : > { %v3282_v27 = vpop.eup %3281 }
 0x167   : > { %v931_v28 = vmul.f32 %v3282_v27, %v915_v8 }
 0x169   : > { %v939_v32 = vmul.f32 %v2829_v29, %v931_v28 }
 0x16a   : > { %v3284_v30 = vpop.eup %3283 }
 0x16b   : > { %v932_v31 = vmul.f32 %v3284_v30, %v916_v12  ;;  %v947_v35 = vadd.f32 %v2830_v33, %v939_v32 }
 0x16d   : > { %v940_v34 = vmul.f32 %v2829_v29, %v932_v31 }
 0x16f   : > { %v948_v36 = vadd.f32 %v2830_v33, %v940_v34 }
 0x171   : > { %v949_v38 = vpack.c.bf16 %v948_v36, %v947_v35 }
 0x173   : > { %3018 = vmatmul.mubr.msk.bf16.vlgmr.msra.gmra.mrb[0].mxu0 %vm905_vm1, %v949_v38 }
 0x174   : > { %3022 = vmatpush3.bf16.msra.mxu0 %v3241_v37  ;;  %3029 = vmatprep.mubr.msk.bf16.mxu0 %vm3395_vm2, %v3394_v17 }
 0x175   : > { %3023 = vmatprep.subr.bf16.mxu0 %v3394_v17 }
 0x178   : > { %3024 = vmatpush3.bf16.msra.mxu0 %v3242_v39 }
 0x179   : > { %3025 = vmatprep.subr.bf16.mxu0 %v3394_v17 }
 0x17c   : > { %3026 = vmatpush3.bf16.msra.mxu0 %v3243_v40 }
 0x17d   : > { %3027 = vmatprep.subr.bf16.mxu0 %v3394_v17 }
 0x180   : > { %3028 = vmatpush3.bf16.msra.mxu0 %v3244_v41 }
 0x181   : > { %3033 = vmatprep.subr.bf16.mxu0 %v3394_v17 }
 0x183   : > { %3030 = vmatmul.mubr.msk.bf16.vlgmr.msra.gmra.mrb[4].mxu0 %vm905_vm1, %v949_v38 }
 0x184   : > { %3034 = vmatpush3.bf16.msra.mxu0 %v3245_v42  ;;  %3041 = vmatprep.mubr.msk.bf16.mxu0 %vm3395_vm2, %v3394_v17 }
 0x185   : > { %3035 = vmatprep.subr.bf16.mxu0 %v3394_v17 }
 0x188   : > { %3036 = vmatpush3.bf16.msra.mxu0 %v3246_v43 }
 0x189   : > { %3037 = vmatprep.subr.bf16.mxu0 %v3394_v17 }
 0x18c   : > { %3038 = vmatpush3.bf16.msra.mxu0 %v3247_v44 }
 0x18d   : > { %3039 = vmatprep.subr.bf16.mxu0 %v3394_v17 }
 0x190   : > { %3040 = vmatpush3.bf16.msra.mxu0 %v3248_v45 }
 0x193   : > { %3042 = vmatmul.mubr.msk.bf16.vlgmr.msra.gmra.mrb[8].mxu0 %vm905_vm1, %v949_v38 }
 0x246   : > { %v1026_v47 = vpop.f32.mrb[0].mxu0 }
 0x247   : > { %v3689_v48 = vadd.f32 %v2831_v46, %v1026_v47  ;;  %v3019_v49 = vpop.f32.mrb[1].mxu0 }
 0x248   : > { %v1029_v50 = vpop.f32.mrb[2].mxu0 }
 0x249   : > { %v3020_v51 = vpop.f32.mrb[3].mxu0  ;;  %3049 = vmatprep.mubr.msk.f32.mxu1 %vm1195_vm3, %v3689_v48  ;;  %v3710_v62 = vadd.f32 %v2831_v46, %v1029_v50 }
 0x256   : > { %v1106_v53 = vpop.f32.mrb[4].mxu0 }
 0x257   : > { %v3031_v54 = vpop.f32.mrb[5].mxu0  ;;  %v1107_v56 = vadd.f32 %v2837_v52, %v1106_v53 }
 0x258   : > { %v1109_v55 = vpop.f32.mrb[6].mxu0 }
 0x259   : > { %v1110_v57 = vadd.f32 %v2837_v52, %v1109_v55  ;;  %v3032_v58 = vpop.f32.mrb[7].mxu0 }
 0x25b   : > { %v3125_v60 = vpack.c.bf16 %v1110_v57, %v1107_v56  ;;  %v3704_v61 = vpack.i.bf16 %v1110_v57, %v1107_v56 }
 0x25d   : > { %3127 = vmatprep.subr.msk.bf16.mxu1 %vm3700_vm4, %v3125_v60 }
 0x25e   : > { %3130 = vmatpush3.bf16.xpose.msk.msra.mxu1 %vm3700_vm4, %v3125_v60 }
 0x265   : > { %3050 = vmatmul.mubr.msk.f32.vlgmr.msra.gmra.mrb[0].mxu1 %vm1195_vm3, %v3710_v62 }
 0x266   : > { %v1186_v0 = vpop.f32.mrb[8].mxu0 }
 0x267   : > { %v3043_v1 = vpop.f32.mrb[9].mxu0  ;;  %v1187_v5 = vadd.f32 %v2843_v63, %v1186_v0 }
 0x268   : > { %v1189_v4 = vpop.f32.mrb[10].mxu0 }
 0x269   : > { %v1190_v6 = vadd.f32 %v2843_v63, %v1189_v4  ;;  %v3044_v7 = vpop.f32.mrb[11].mxu0 }
 0x26b   : > { %v3131_v8 = vpack.c.bf16 %v1190_v6, %v1187_v5  ;;  %v3719_v9 = vpack.i.bf16 %v1190_v6, %v1187_v5 }
 0x26d   : > { %3132 = vmatprep.subr.bf16.mxu1 %v3131_v8 }
 0x26e   : > { %3134 = vmatpush3.bf16.msra.mxu1 %v3131_v8 }
 0x338   : > { %v3051_v10 = vpop.f32.mrb[0].mxu1 }
 0x339   : > { %v1284_v12 = vmul.f32 0.25, %v3051_v10  ;;  %v1274_v13 = vpop.f32.mrb[1].mxu1 }
 0x33a   : > { %v1283_v15 = vmul.f32 0.25, %v1274_v13 }
 0x33b   : > { %v1286_v16 = vadd.f32 %v1284_v12, %v3724_v11 }
 0x33c   : > { %v1285_v18 = vadd.f32 %v1283_v15, %v3729_v14 }
 0x33d   : > { %v1290_v19 = vsel %vm1195_vm3, %v1286_v16, -inf }
 0x33e   : > { %1291 = vmax.xlane.f32.xlu1 %v1290_v19  ;;  %v1287_v20 = vsel %vm1195_vm3, %v1285_v18, -inf }
 0x33f   : > { %1288 = vmax.xlane.f32.xlu0 %v1287_v20 }
 0x3cb   : > { %v1292_v21 = vpop.xlane.xlu1 %1291 }
 0x3cc   : > { %v1294_v22 = vsub.f32 %v1286_v16, %v1292_v21  ;;  %v1289_v23 = vpop.xlane.xlu0 %1288 }
 0x3cd   : > { %v1293_v24 = vsub.f32 %v1285_v18, %v1289_v23 }
 0x3ce   : > { %v1297_v25 = vmul.f32 1.442695, %v1294_v22 }
 0x3cf   : > { %v1295_v26 = vmul.f32 1.442695, %v1293_v24 }
 0x3d0   : > { %3285 = vpow2.f32 %v1297_v25 }
 0x3d1   : > { %3287 = vpow2.f32 %v1295_v26 }
 0x3da   : > { %v3286_v27 = vpop.eup %3285 }
 0x3db   : > { %v3288_v28 = vpop.eup %3287  ;;  %v1302_v29 = vsel %vm1195_vm3, %v3286_v27, 0.0 }
 0x3dc   : > { %1303 = vadd.xlane.f32.xlu1 %v1302_v29  ;;  %v1299_v30 = vsel %vm1195_vm3, %v3288_v28, 0.0 }
 0x3dd   : > { %1300 = vadd.xlane.f32.xlu0 %v1299_v30 }
 0x3ed   : > { %1390 = vrot.lane.b32.xlu1 %v3689_v48, %s3396_s21 }
 0x3f1   : > { %3198 = vrot.lane.b32.xlu1 %v3704_v61, %s3397_s1 }
 0x3f3   : > { %3193 = vrot.lane.b32.xlu0 %v3704_v61, %s3396_s21 }
 0x3f5   : > { %1392 = vrot.lane.b32.xlu1 %v3710_v62, %s3396_s21 }
 0x3f7   : > { %1596 = vrot.lane.b32.xlu0 %v3689_v48, %s3397_s1 }
 0x3f9   : > { %1598 = vrot.lane.b32.xlu1 %v3710_v62, %s3397_s1 }
 0x469   : > { %v1304_v31 = vpop.xlane.xlu1 %1303 }
 0x46a   : > { %3289 = vrcp.f32 %v1304_v31  ;;  %v1301_v32 = vpop.xlane.xlu0 %1300 }
 0x46b   : > { %3291 = vrcp.f32 %v1301_v32 }
 0x46d   : > { %v1391_v33 = vpop.permute.xlu1 %1390 }
 0x46e   : > { %v3194_v34 = vpop.permute.xlu0 %3193 }
 0x46f   : > { %v3196_v35 = vunpack.i.h.bf16 %v3194_v34  ;;  %v3195_v36 = vunpack.i.l.bf16 %v3194_v34 }
 0x471   : > { %v3135_v37 = vpack.c.bf16 %v3196_v35, %v3195_v36  ;;  %v3199_v38 = vpop.permute.xlu1 %3198 }
 0x472   : > { %v3201_v41 = vunpack.i.h.bf16 %v3199_v38  ;;  %v3200_v42 = vunpack.i.l.bf16 %v3199_v38  ;;  %v1597_v47 = vpop.permute.xlu0 %1596 }
 0x473   : > { %3137 = vmatprep.subr.msk.bf16.mxu1 %vm3700_vm4, %v3135_v37 }
 0x474   : > { %v3290_v39 = vpop.eup %3289  ;;  %v3145_v45 = vpack.c.bf16 %v3201_v41, %v3200_v42 }
 0x475   : > { %v3292_v40 = vpop.eup %3291  ;;  %v1308_v44 = vmul.f32 %v3290_v39, %v3286_v27  ;;  %v1393_v46 = vpop.permute.xlu1 %1392 }
 0x476   : > { %v1307_v43 = vmul.f32 %v3292_v40, %v3288_v28 }
 0x478   : > { %3056 = vmatprep.mubr.msk.f32.mxu1 %vm1195_vm3, %v1307_v43 }
 0x479   : > { %3057 = vmatmul.mubr.msk.f32.vlgmr.msra.gmra.mrb[2].mxu1 %vm1195_vm3, %v1308_v44  ;;  %v1599_v49 = vpop.permute.xlu1 %1598 }
 0x47a   : > { %3140 = vmatpush3.bf16.xpose.msk.msra.mxu1 %vm3700_vm4, %v3135_v37  ;;  %3063 = vmatprep.mubr.msk.f32.mxu1 %vm1195_vm3, %v1391_v33 }
 0x47b   : > { %3147 = vmatprep.subr.msk.bf16.mxu1 %vm3700_vm4, %v3145_v45 }
 0x481   : > { %3064 = vmatmul.mubr.msk.f32.vlgmr.msra.gmra.mrb[4].mxu1 %vm1195_vm3, %v1393_v46 }
 0x482   : > { %3150 = vmatpush3.bf16.xpose.msk.msra.mxu1 %vm3700_vm4, %v3145_v45  ;;  %3077 = vmatprep.mubr.msk.f32.mxu1 %vm1195_vm3, %v1597_v47 }
 0x489   : > { %3078 = vmatmul.mubr.msk.f32.vlgmr.msra.gmra.mrb[6].mxu1 %vm1195_vm3, %v1599_v49 }
 0x54c   : > { %v3763_v50 = vpop.f32.mrb[2].mxu1 }
 0x54d   : > { %v3765_v51 = vpop.f32.mrb[3].mxu1 }
 0x554   : > { %v3065_v52 = vpop.f32.mrb[4].mxu1 }
 0x555   : > { %v1482_v53 = vmul.f32 0.25, %v3065_v52  ;;  %v1472_v54 = vpop.f32.mrb[5].mxu1 }
 0x556   : > { %v1481_v55 = vmul.f32 0.25, %v1472_v54 }
 0x557   : > { %v1484_v56 = vadd.f32 %v1482_v53, %v3724_v11 }
 0x558   : > { %v1483_v57 = vadd.f32 %v1481_v55, %v3729_v14 }
 0x559   : > { %v1488_v58 = vsel %vm1195_vm3, %v1484_v56, -inf }
 0x55a   : > { %1489 = vmax.xlane.f32.xlu1 %v1488_v58  ;;  %v1485_v60 = vsel %vm1195_vm3, %v1483_v57, -inf }
 0x55b   : > { %1486 = vmax.xlane.f32.xlu0 %v1485_v60 }
 0x55c   : > { %v3079_v63 = vpop.f32.mrb[6].mxu1 }
 0x55d   : > { %v1678_v0 = vpop.f32.mrb[7].mxu1  ;;  %v1688_v1 = vmul.f32 0.25, %v3079_v63 }
 0x55e   : > { %v1687_v4 = vmul.f32 0.25, %v1678_v0 }
 0x55f   : > { %v1690_v7 = vadd.f32 %v1688_v1, %v3724_v11 }
 0x560   : > { %v1689_v5 = vadd.f32 %v1687_v4, %v3729_v14 }
 0x561   : > { %v1694_v8 = vsel %vm1195_vm3, %v1690_v7, -inf }
 0x562   : > { %v1691_v6 = vsel %vm1195_vm3, %v1689_v5, -inf }
 0x563   : > { %1692 = vmax.xlane.f32.xlu0 %v1691_v6 }
 0x567   : > { %1695 = vmax.xlane.f32.xlu0 %v1694_v8 }
 0x5e7   : > { %v1490_v10 = vpop.xlane.xlu1 %1489 }
 0x5e8   : > { %v1492_v12 = vsub.f32 %v1484_v56, %v1490_v10  ;;  %v1487_v13 = vpop.xlane.xlu0 %1486 }
 0x5e9   : > { %v1491_v15 = vsub.f32 %v1483_v57, %v1487_v13 }
 0x5ea   : > { %v1495_v16 = vmul.f32 1.442695, %v1492_v12 }
 0x5eb   : > { %v1493_v18 = vmul.f32 1.442695, %v1491_v15 }
 0x5ec   : > { %3293 = vpow2.f32 %v1495_v16 }
 0x5ed   : > { %3295 = vpow2.f32 %v1493_v18 }
 0x5f0   : > { %v1693_v19 = vpop.xlane.xlu0 %1692 }
 0x5f1   : > { %v1697_v20 = vsub.f32 %v1689_v5, %v1693_v19 }
 0x5f3   : > { %v1699_v21 = vmul.f32 1.442695, %v1697_v20 }
 0x5f4   : > { %v1696_v22 = vpop.xlane.xlu0 %1695 }
 0x5f5   : > { %3297 = vpow2.f32 %v1699_v21  ;;  %v1698_v23 = vsub.f32 %v1690_v7, %v1696_v22 }
 0x5f6   : > { %v3294_v24 = vpop.eup %3293 }
 0x5f7   : > { %v3296_v25 = vpop.eup %3295  ;;  %v1701_v26 = vmul.f32 1.442695, %v1698_v23  ;;  %v1500_v27 = vsel %vm1195_vm3, %v3294_v24, 0.0 }
 0x5f8   : > { %1501 = vadd.xlane.f32.xlu1 %v1500_v27  ;;  %v1497_v28 = vsel %vm1195_vm3, %v3296_v25, 0.0 }
 0x5f9   : > { %3299 = vpow2.f32 %v1701_v26  ;;  %1498 = vadd.xlane.f32.xlu0 %v1497_v28 }
 0x5ff   : > { %v3298_v29 = vpop.eup %3297 }
 0x600   : > { %v1703_v30 = vsel %vm1195_vm3, %v3298_v29, 0.0 }
 0x601   : > { %1704 = vadd.xlane.f32.xlu0 %v1703_v30 }
 0x603   : > { %v3300_v31 = vpop.eup %3299 }
 0x604   : > { %v1706_v32 = vsel %vm1195_vm3, %v3300_v31, 0.0 }
 0x605   : > { %1707 = vadd.xlane.f32.xlu1 %v1706_v32 }
 0x616   : > { %3208 = vrot.lane.b32.xlu1 %v3719_v9, %s3397_s1 }
 0x617   : > { %3203 = vrot.lane.b32.xlu0 %v3719_v9, %s3396_s21 }
 0x61a   : > { %3213 = vrot.lane.b32.xlu1 %v3704_v61, %s3398_s11 }
 0x61b   : > { %1802 = vrot.lane.b32.xlu0 %v3710_v62, %s3398_s11 }
 0x61e   : > { %1800 = vrot.lane.b32.xlu1 %v3689_v48, %s3398_s11 }
 0x685   : > { %v1502_v34 = vpop.xlane.xlu1 %1501 }
 0x686   : > { %v1499_v33 = vpop.xlane.xlu0 %1498 }
 0x687   : > { %3301 = vrcp.f32 %v1499_v33 }
 0x688   : > { %3303 = vrcp.f32 %v1502_v34  ;;  %v3249_v34 = vld [vmem:[%s3586_s24] sm:$0xff]  }
 0x68e   : > { %v1705_v35 = vpop.xlane.xlu0 %1704 }
 0x68f   : > { %3305 = vrcp.f32 %v1705_v35  ;;  %v3250_v35 = vld [vmem:[%s3586_s24 + $0x8] sm:$0xff]  }
 0x691   : > { %v3302_v36 = vpop.eup %3301 }
 0x692   : > { %v1708_v37 = vpop.xlane.xlu1 %1707  ;;  %v3204_v38 = vpop.permute.xlu0 %3203  ;;  %v1505_v39 = vmul.f32 %v3302_v36, %v3296_v25  ;;  %v3251_v36 = vld [vmem:[%s3586_s24 + $0x10] sm:$0xff]  }
 0x693   : > { %3307 = vrcp.f32 %v1708_v37  ;;  %v3206_v40 = vunpack.i.h.bf16 %v3204_v38  ;;  %v3205_v41 = vunpack.i.l.bf16 %v3204_v38  ;;  %v3304_v62 = vpop.eup %3303  ;;  %v3252_v37 = vld [vmem:[%s3586_s24 + $0x18] sm:$0xff]  }
 0x694   : > { %3070 = vmatprep.mubr.msk.f32.mxu0 %vm1195_vm3, %v1505_v39  ;;  %v1506_v45 = vmul.f32 %v3304_v62, %v3294_v24 }
 0x695   : > { %v3141_v61 = vpack.c.bf16 %v3206_v40, %v3205_v41 }
 0x696   : > { %v3209_v42 = vpop.permute.xlu1 %3208  ;;  %v1803_v58 = vpop.permute.xlu0 %1802 }
 0x697   : > { %v3211_v43 = vunpack.i.h.bf16 %v3209_v42  ;;  %v3210_v48 = vunpack.i.l.bf16 %v3209_v42  ;;  %3142 = vmatprep.subr.bf16.mxu0 %v3141_v61 }
 0x698   : > { %3144 = vmatpush3.bf16.msra.mxu0 %v3141_v61 }
 0x699   : > { %v3306_v44 = vpop.eup %3305  ;;  %v3151_v46 = vpack.c.bf16 %v3211_v43, %v3210_v48 }
 0x69a   : > { %v3214_v47 = vpop.permute.xlu1 %3213  ;;  %v1711_v49 = vmul.f32 %v3306_v44, %v3298_v29 }
 0x69b   : > { %v3216_v52 = vunpack.i.h.bf16 %v3214_v47  ;;  %v3215_v53 = vunpack.i.l.bf16 %v3214_v47  ;;  %3071 = vmatmul.mubr.msk.f32.vlgmr.msra.gmra.mrb[12].mxu0 %vm1195_vm3, %v1506_v45  ;;  %3152 = vmatprep.subr.bf16.mxu0 %v3151_v46 }
 0x69c   : > { %3154 = vmatpush3.bf16.msra.mxu0 %v3151_v46  ;;  %3084 = vmatprep.mubr.msk.f32.mxu0 %vm1195_vm3, %v1711_v49 }
 0x69d   : > { %v3308_v54 = vpop.eup %3307  ;;  %v3155_v55 = vpack.c.bf16 %v3216_v52, %v3215_v53 }
 0x69e   : > { %v1712_v56 = vmul.f32 %v3308_v54, %v3300_v31  ;;  %v1801_v57 = vpop.permute.xlu1 %1800 }
 0x69f   : > { %3157 = vmatprep.subr.msk.bf16.mxu0 %vm3700_vm4, %v3155_v55 }
 0x6a0   : > { %3085 = vmatmul.mubr.msk.f32.vlgmr.msra.gmra.mrb[14].mxu0 %vm1195_vm3, %v1712_v56 }
 0x6a1   : > { %3091 = vmatprep.mubr.msk.f32.mxu0 %vm1195_vm3, %v1801_v57 }
 0x6a5   : > { %3160 = vmatpush3.bf16.xpose.msk.msra.mxu0 %vm3700_vm4, %v3155_v55 }
 0x6ac   : > { %3092 = vmatmul.mubr.msk.f32.vlgmr.msra.gmra.mrb[16].mxu0 %vm1195_vm3, %v1803_v58 }
 0x76e   : > { %v3072_v60 = vpop.f32.mrb[12].mxu0 }
 0x76f   : > { %v1587_v63 = vpop.f32.mrb[13].mxu0 }
 0x770   : > { %v3222_v0 = vpack.i.bf16 %v3072_v60, %v1587_v63 }
 0x773   : > { %v3086_v1 = vpop.f32.mrb[14].mxu0 }
 0x774   : > { %v1791_v4 = vpop.f32.mrb[15].mxu0 }
 0x775   : > { %v3227_v5 = vpack.i.bf16 %v3086_v1, %v1791_v4 }
 0x77f   : > { %v3093_v6 = vpop.f32.mrb[16].mxu0 }
 0x780   : > { %v1892_v7 = vmul.f32 0.25, %v3093_v6  ;;  %v1882_v8 = vpop.f32.mrb[17].mxu0 }
 0x781   : > { %v1891_v10 = vmul.f32 0.25, %v1882_v8 }
 0x782   : > { %v1894_v12 = vadd.f32 %v1892_v7, %v3724_v11 }
 0x783   : > { %v1893_v13 = vadd.f32 %v1891_v10, %v3729_v14 }
 0x784   : > { %v1898_v59 = vsel %vm1195_vm3, %v1894_v12, -inf }
 0x785   : > { %1899 = vmax.xlane.f32.xlu0 %v1898_v59  ;;  %v1895_v15 = vsel %vm1195_vm3, %v1893_v13, -inf }
 0x786   : > { %1896 = vmax.xlane.f32.xlu1 %v1895_v15 }
 0x797   : > { %3218 = vrot.lane.b32.xlu1 %v3719_v9, %s3398_s11  ;;  %s4002_s11 = sld [smem:[#allocation23_spill]] (!%p2911_p8) }
 0x79b   : > { %3228 = vrot.lane.b32.xlu1 %v3227_v5, %s3399_s23 }
 0x812   : > { %v1900_v16 = vpop.xlane.xlu0 %1899 }
 0x813   : > { %v1902_v18 = vsub.f32 %v1894_v12, %v1900_v16  ;;  %v1897_v19 = vpop.xlane.xlu1 %1896  ;;  %v3255_v16 = vld [vmem:[%s3604_s26 + $0x4] ss:$8 sps:$4 sm:$0xff]  }
 0x814   : > { %v1901_v20 = vsub.f32 %v1893_v13, %v1897_v19  ;;  %2230 = vmatprep.subr.bf16.mxu0 %v3255_v16  ;;  %v3258_v19 = vld [vmem:[%s3604_s26 + $0x14] ss:$8 sps:$4 sm:$0xff]  }
 0x815   : > { %v1905_v21 = vmul.f32 1.442695, %v1902_v18  ;;  %v3253_v18 = vld [vmem:[%s3604_s26] ss:$8 sps:$4 sm:$0xff]  }
 0x816   : > { %v1903_v22 = vmul.f32 1.442695, %v1901_v20  ;;  %2231 = vmatpush1.bf16.msra.mxu0 %v3253_v18  ;;  %v3256_v20 = vld [vmem:[%s3604_s26 + $0x10] ss:$8 sps:$4 sm:$0xff]  }
 0x817   : > { %v3219_v11 = vpop.permute.xlu1 %3218  ;;  %2232 = vmatprep.subr.bf16.mxu0 %v3258_v19 }
 0x818   : > { %3309 = vpow2.f32 %v1903_v22  ;;  %v3221_v14 = vunpack.i.h.bf16 %v3219_v11  ;;  %v3220_v23 = vunpack.i.l.bf16 %v3219_v11  ;;  %v3259_v22 = vld [vmem:[%s3604_s26 + $0x20] ss:$8 sps:$4 sm:$0xff]   ;;  %v3262_v11 = vld [vmem:[%s3604_s26 + $0x30] ss:$8 sps:$4 sm:$0xff]  }
 0x819   : > { %3311 = vpow2.f32 %v1905_v21  ;;  %v3261_v21 = vld [vmem:[%s3604_s26 + $0x24] ss:$8 sps:$4 sm:$0xff]  }
 0x81a   : > { %v3161_v24 = vpack.c.bf16 %v3221_v14, %v3220_v23  ;;  %2233 = vmatpush1.bf16.msra.mxu0 %v3256_v20  ;;  %v3264_v14 = vld [vmem:[%s3604_s26 + $0x34] ss:$8 sps:$4 sm:$0xff]   ;;  %v3402_v23 = vmov 0  }
 0x81b   : > { %v3229_v42 = vpop.permute.xlu1 %3228  ;;  %2234 = vmatprep.subr.bf16.mxu0 %v3261_v21  ;;  %2262 = vmatprep.mubr.bf16.mxu0 %v3402_v23 }
 0x81c   : > { %3162 = vmatprep.subr.bf16.mxu1 %v3161_v24  ;;  %v3230_v44 = vunpack.i.l.bf16 %v3229_v42 }
 0x81d   : > { %3164 = vmatpush3.bf16.msra.mxu1 %v3161_v24 }
 0x81e   : > { %3101 = vmatprep.subr.bf16.mxu1 %v3394_v17  ;;  %2235 = vmatpush1.bf16.msra.mxu0 %v3259_v22 }
 0x81f   : > { %2236 = vmatprep.subr.bf16.mxu0 %v3264_v14 }
 0x822   : > { %v3310_v25 = vpop.eup %3309  ;;  %2237 = vmatpush1.bf16.msra.mxu0 %v3262_v11 }
 0x823   : > { %v1907_v9 = vsel %vm1195_vm3, %v3310_v25, 0.0  ;;  %v3312_v26 = vpop.eup %3311 }
 0x824   : > { %1908 = vadd.xlane.f32.xlu0 %v1907_v9  ;;  %v1910_v27 = vsel %vm1195_vm3, %v3312_v26, 0.0 }
 0x828   : > { %1911 = vadd.xlane.f32.xlu0 %v1910_v27 }
 0x83e   : > { %3223 = vrot.lane.b32.xlu0 %v3222_v0, %s3400_s0 }
 0x8b1   : > { %v1909_v28 = vpop.xlane.xlu0 %1908 }
 0x8b2   : > { %3313 = vrcp.f32 %v1909_v28 }
 0x8b5   : > { %v1912_v29 = vpop.xlane.xlu0 %1911 }
 0x8b6   : > { %3315 = vrcp.f32 %v1912_v29 }
 0x8b9   : > { %v3224_v41 = vpop.permute.xlu0 %3223 }
 0x8ba   : > { %v3226_v61 = vunpack.i.h.bf16 %v3224_v41  ;;  %v3225_v62 = vunpack.i.l.bf16 %v3224_v41  ;;  %v3266_v41 = vld [vmem:[%s3616_s28] sm:$0xff]  }
 0x8bc   : > { %v3314_v30 = vpop.eup %3313  ;;  %v2029_v43 = vsel %vm1195_vm3, %v3763_v50, %v3226_v61  ;;  %v2028_v48 = vsel %vm1195_vm3, %v3765_v51, %v3225_v62  ;;  %v2873_v50 = vld [vmem:[%s4000_s6] ss:$0 sm:$0xff]  ;;  %v3267_v61 = vld [vmem:[%s3616_s28 + $0x48] sm:$0xff]  }
 0x8bd   : > { %v1915_v31 = vmul.f32 %v3314_v30, %v3310_v25  ;;  %v2031_v49 = vsel %vm2030_vm5, %v2028_v48, %v3230_v44  ;;  %v3268_v62 = vld [vmem:[%s3616_s28 + $0x8] sm:$0xff]   ;;  %v3271_v48 = vld [vmem:[%s3616_s28 + $0x58] sm:$0xff]   ;;  %v3273_v44 = vld [vmem:[%s3616_s28 + $0x60] sm:$0xff]  }
 0x8bf   : > { %3098 = vmatprep.mubr.msk.f32.mxu1 %vm1195_vm3, %v1915_v31  ;;  %v2879_v31 = vld [vmem:[%s870_s29] ss:$0 sm:$0xff]  ;;  %s4004_s29 = sld [smem:[#allocation22_spill]] (!%p2911_p8) }
 0x8c0   : > { %v3316_v32 = vpop.eup %3315 }
 0x8c1   : > { %v1916_v33 = vmul.f32 %v3316_v32, %v3312_v26 }
 0x8c3   : > { %3099 = vmatmul.mubr.msk.f32.vlgmr.msra.gmra.mrb[8].mxu1 %vm1195_vm3, %v1916_v33 }
 0x8c4   : > { %3109 = vmatprep.mubr.msk.bf16.mxu1 %vm3395_vm2, %v3394_v17  ;;  %3102 = vmatpush3.bf16.msra.mxu1 %v3249_v34 }
 0x8c5   : > { %3103 = vmatprep.subr.bf16.mxu1 %v3394_v17 }
 0x8c8   : > { %3104 = vmatpush3.bf16.msra.mxu1 %v3250_v35  ;;  %v2880_v35 = vld [vmem:[%s4001_s30] ss:$0 sm:$0xff] }
 0x8c9   : > { %3105 = vmatprep.subr.bf16.mxu1 %v3394_v17 }
 0x8cc   : > { %3106 = vmatpush3.bf16.msra.mxu1 %v3251_v36 }
 0x8cd   : > { %3107 = vmatprep.subr.bf16.mxu1 %v3394_v17  ;;  %v3231_v17 = vunpack.i.h.bf16 %v3229_v42  ;;  %v3269_v42 = vld [vmem:[%s3616_s28 + $0x50] sm:$0xff]  }
 0x8cf   : > { %v2032_v52 = vsel %vm2030_vm5, %v2029_v43, %v3231_v17  ;;  %v3270_v43 = vld [vmem:[%s3616_s28 + $0x10] sm:$0xff]   ;;  %v3272_v17 = vld [vmem:[%s3616_s28 + $0x18] sm:$0xff]  }
 0x8d0   : > { %3108 = vmatpush3.bf16.msra.mxu1 %v3252_v37 }
 0x996   : > { %v3100_v38 = vpop.f32.mrb[8].mxu1 }
 0x997   : > { %v1995_v39 = vpop.f32.mrb[9].mxu1 }
 0x998   : > { %v3232_v40 = vpack.i.bf16 %v3100_v38, %v1995_v39 }
 0x99a   : > { %3233 = vrot.lane.b32.xlu1 %v3232_v40, %s3401_s7  ;;  %v3265_v40 = vld [vmem:[%s3616_s28 + $0x40] sm:$0xff]  }
 0x99b   : > { %2982 = vmatprep.subr.bf16.mxu1 %v3265_v40 }
 0xa0c   : > { %v3234_v45 = vpop.permute.xlu1 %3233 }
 0xa0d   : > { %v3236_v46 = vunpack.i.h.bf16 %v3234_v45  ;;  %v3235_v47 = vunpack.i.l.bf16 %v3234_v45  ;;  %v3274_v45 = vld [vmem:[%s3616_s28 + $0x20] sm:$0xff]  }
 0xa0f   : > { %v2035_v53 = vsel %vm2033_vm6, %v2032_v52, %v3236_v46  ;;  %v2034_v54 = vsel %vm2033_vm6, %v2031_v49, %v3235_v47  ;;  %v3275_v46 = vld [vmem:[%s3616_s28 + $0x68] sm:$0xff]   ;;  %v3277_v49 = vld [vmem:[%s3616_s28 + $0x70] sm:$0xff]  }
 0xa10   : > { %v2036_v55 = vpack.c.bf16 %v2035_v53, %v2034_v54  ;;  %v3276_v47 = vld [vmem:[%s3616_s28 + $0x28] sm:$0xff]   ;;  %v3278_v52 = vld [vmem:[%s3616_s28 + $0x30] sm:$0xff]   ;;  %v3279_v53 = vld [vmem:[%s3616_s28 + $0x78] sm:$0xff]  }
 0xa11   : > { %v3280_v54 = vld [vmem:[%s3616_s28 + $0x38] sm:$0xff]   ;;  %s2492_s28 = scalar_lea.vmem (!%p2911_p8), [#allocation2], %s2491_s25 }
 0xa12   : > { %3110 = vmatmul.mubr.msk.bf16.vlgmr.msra.gmra.mrb[12].mxu1 %vm905_vm1, %v2036_v55  ;;  %v2177_v55 = vlaneseq }
 0xa13   : > { %2983 = vmatpush3.bf16.msra.mxu1 %v3266_v41 }
 0xa14   : > { %2984 = vmatprep.subr.bf16.mxu1 %v3267_v61 }
 0xa17   : > { %2985 = vmatpush3.bf16.msra.mxu1 %v3268_v62 }
 0xa18   : > { %2986 = vmatprep.subr.bf16.mxu1 %v3269_v42 }
 0xa1b   : > { %2987 = vmatpush3.bf16.msra.mxu1 %v3270_v43 }
 0xa1c   : > { %2988 = vmatprep.subr.bf16.mxu1 %v3271_v48 }
 0xa1f   : > { %2989 = vmatpush3.bf16.msra.mxu1 %v3272_v17 }
 0xa20   : > { %2990 = vmatprep.subr.bf16.mxu1 %v3273_v44 }
 0xa23   : > { %2991 = vmatpush3.bf16.msra.mxu1 %v3274_v45 }
 0xa24   : > { %2992 = vmatprep.subr.bf16.mxu1 %v3275_v46 }
 0xa27   : > { %2993 = vmatpush3.bf16.msra.mxu1 %v3276_v47 }
 0xa28   : > { %2994 = vmatprep.subr.bf16.mxu1 %v3277_v49 }
 0xa2b   : > { %2995 = vmatpush3.bf16.msra.mxu1 %v3278_v52 }
 0xa2c   : > { %2996 = vmatprep.subr.bf16.mxu1 %v3279_v53  ;;  %v3337_v53 = vld [vmem:[%s4002_s11] sm:$0xff] (!%p2911_p8)  }
 0xa2f   : > { %2997 = vmatpush3.bf16.msra.mxu1 %v3280_v54  ;;  %v3403_v54 = vmov (!%p2911_p8), 0.0  }
 0xa30   : > { %3113 = vmatprep.subr.bf16.mxu0 (!%p2911_p8), %v3403_v54 }
 0xae5   : > { %v2113_v51 = vpop.f32.mrb[12].mxu1 }
 0xae6   : > { %v2114_v56 = vadd.f32 %v2873_v50, %v2113_v51  ;;  %v3111_v57 = vpop.f32.mrb[13].mxu1 }
 0xae7   : > { %v2116_v58 = vpop.f32.mrb[14].mxu1 }
 0xae8   : > { %v3830_v60 = vadd.f32 %v2114_v56, %v3629_v2  ;;  %v2117_v63 = vadd.f32 %v2873_v50, %v2116_v58  ;;  %v3112_v0 = vpop.f32.mrb[15].mxu1  ;;  %v2178_v50 = vshrl.u32 %v2177_v55, 7  ;;  %v2175_v56 = vld [vmem:[%s3610_s19] sm:$0x3]  ;;  %v3338_v55 = vld [vmem:[%s4002_s11 + $0x8] sm:$0xff] (!%p2911_p8)  }
 0xaea   : > { %v3833_v1 = vadd.f32 %v2117_v63, %v3631_v3  ;;  %v2124_v4 = vsel %vm905_vm1, %v3830_v60, 0.0  ;;  %v2179_v51 = vsub.s32 0, %v2178_v50  ;;  %v2183_v57 = vsub.s32 1, %v2178_v50  ;;  %v3339_v50 = vld [vmem:[%s4002_s11 + $0x10] sm:$0xff] (!%p2911_p8)  }
 0xaeb   : > { %2125 = vadd.xlane.f32.xlu1 %v2124_v4 }
 0xaec   : > { %v2127_v5 = vsel %vm905_vm1, %v3833_v1, 0.0  ;;  %v2180_v58 = vrot.slane %v2175_v56, %v2179_v51  ;;  %v2184_v63 = vrot.slane %v2175_v56, %v2183_v57  ;;  %v3340_v51 = vld [vmem:[%s4002_s11 + $0x18] sm:$0xff] (!%p2911_p8)  }
 0xaed   : > { %2128 = vadd.xlane.f32.xlu0 %v2127_v5 }
 0xb78   : > { %v2126_v6 = vpop.xlane.xlu1 %2125 }
 0xb79   : > { %v2130_v7 = vmul.f32 0.015625, %v2126_v6 }
 0xb7a   : > { %v2129_v2 = vpop.xlane.xlu0 %2128 }
 0xb7b   : > { %v2132_v8 = vsub.f32 %v3830_v60, %v2130_v7  ;;  %v2131_v10 = vmul.f32 0.015625, %v2129_v2 }
 0xb7d   : > { %v2133_v3 = vsub.f32 %v3833_v1, %v2131_v10  ;;  %v2134_v12 = vmul.f32 %v2132_v8, %v2132_v8 }
 0xb7f   : > { %v2136_v13 = vsel %vm905_vm1, %v2134_v12, 0.0  ;;  %v2135_v59 = vmul.f32 %v2133_v3, %v2133_v3 }
 0xb80   : > { %2137 = vadd.xlane.f32.xlu0 %v2136_v13 }
 0xb81   : > { %v2139_v15 = vsel %vm905_vm1, %v2135_v59, 0.0 }
 0xb84   : > { %2140 = vadd.xlane.f32.xlu0 %v2139_v15 }
 0xc0d   : > { %v2138_v24 = vpop.xlane.xlu0 %2137 }
 0xc0e   : > { %v2142_v25 = vmul.f32 0.015625, %v2138_v24 }
 0xc10   : > { %v2144_v9 = vadd.f32 1e-05, %v2142_v25 }
 0xc11   : > { %v2141_v26 = vpop.xlane.xlu0 %2140 }
 0xc12   : > { %3317 = vrsqrt.f32 %v2144_v9  ;;  %v2143_v27 = vmul.f32 0.015625, %v2141_v26 }
 0xc14   : > { %v2145_v28 = vadd.f32 1e-05, %v2143_v27 }
 0xc16   : > { %3319 = vrsqrt.f32 %v2145_v28 }
 0xc1c   : > { %v3318_v29 = vpop.eup %3317 }
 0xc1d   : > { %v2148_v30 = vmul.f32 %v3318_v29, %v2132_v8 }
 0xc1f   : > { %v2156_v33 = vmul.f32 %v2879_v31, %v2148_v30 }
 0xc20   : > { %v3320_v32 = vpop.eup %3319 }
 0xc21   : > { %v2149_v34 = vmul.f32 %v3320_v32, %v2133_v3  ;;  %v2164_v37 = vadd.f32 %v2880_v35, %v2156_v33 }
 0xc23   : > { %v2157_v36 = vmul.f32 %v2879_v31, %v2149_v34 }
 0xc25   : > { %v2165_v38 = vadd.f32 %v2880_v35, %v2157_v36  ;;  %v2894_v36 = vld [vmem:[%s890_s9] ss:$0 sm:$0xff]  ;;  %s2912_s9 = sld [smem:[#allocation4 + $0x1]] (!%p2911_p8) }
 0xc27   : > { %v2166_v39 = vpack.c.bf16 %v2165_v38, %v2164_v37 }
 0xc29   : > { %2889 = vmatmul.mubr.msk.bf16.vlgmr.msra.gmra.mrb[20].mxu0 %vm905_vm1, %v2166_v39 }
 0xc2a   : > { %3121 = vmatprep.mubr.msk.bf16.mxu0 (!%p2911_p8), %vm3404_vm9, %v3403_v54  ;;  %3114 = vmatpush3.bf16.msra.mxu0 (!%p2911_p8), %v3337_v53 }
 0xc2b   : > { %s2495_s27 = scalar_lea.vmem (!%p2911_p8), [#allocation2], %s2912_s9  ;;  %3115 = vmatprep.subr.bf16.mxu0 (!%p2911_p8), %v3403_v54 }
 0xc2e   : > { %3116 = vmatpush3.bf16.msra.mxu0 (!%p2911_p8), %v3338_v55 }
 0xc2f   : > { %3117 = vmatprep.subr.bf16.mxu0 (!%p2911_p8), %v3403_v54 }
 0xc32   : > { %3118 = vmatpush3.bf16.msra.mxu0 (!%p2911_p8), %v3339_v50 }
 0xc33   : > { %3119 = vmatprep.subr.bf16.mxu0 (!%p2911_p8), %v3403_v54 }
 0xc36   : > { %3120 = vmatpush3.bf16.msra.mxu0 (!%p2911_p8), %v3340_v51 }
 0xcfc   : > { %v2264_v0 = vpop.f32.mrb[20].mxu0 }
 0xcfd   : > { %v2265_v4 = vadd.f32 %v2264_v0, %v2180_v58  ;;  %v2266_v5 = vpop.f32.mrb[21].mxu0  ;;  %v2913_v0 = vld [vmem:[%s4003_s20] ss:$0 sm:$0xff] (!%p2911_p8) }
 0xcfe   : > { %v2267_v6 = vadd.f32 %v2266_v5, %v2184_v63  ;;  %v2268_v7 = vpop.f32.mrb[22].mxu0  ;;  %v2914_v5 = vld [vmem:[%s4004_s29] ss:$0 sm:$0xff] (!%p2911_p8) }
 0xcff   : > { %v2890_v2 = vmul.f32 -1.702, %v2265_v4  ;;  %v2269_v8 = vadd.f32 %v2268_v7, %v2180_v58  ;;  %v2270_v10 = vpop.f32.mrb[23].mxu0 }
 0xd00   : > { %v2891_v3 = vmul.f32 -1.702, %v2267_v6  ;;  %v2271_v12 = vadd.f32 %v2270_v10, %v2184_v63 }
 0xd01   : > { %v2281_v13 = vmul.f32 1.442695, %v2890_v2  ;;  %v2892_v59 = vmul.f32 -1.702, %v2269_v8 }
 0xd02   : > { %v2283_v15 = vmul.f32 1.442695, %v2891_v3  ;;  %v2893_v16 = vmul.f32 -1.702, %v2271_v12 }
 0xd03   : > { %3321 = vpow2.f32 %v2281_v13  ;;  %v2285_v18 = vmul.f32 1.442695, %v2892_v59 }
 0xd04   : > { %3323 = vpow2.f32 %v2283_v15  ;;  %v2287_v19 = vmul.f32 1.442695, %v2893_v16 }
 0xd05   : > { %3325 = vpow2.f32 %v2285_v18 }
 0xd06   : > { %3327 = vpow2.f32 %v2287_v19 }
 0xd0d   : > { %v3322_v20 = vpop.eup %3321 }
 0xd0e   : > { %v3324_v21 = vpop.eup %3323  ;;  %v2289_v22 = vadd.f32 1.0, %v3322_v20 }
 0xd0f   : > { %v3326_v11 = vpop.eup %3325  ;;  %v2290_v14 = vadd.f32 1.0, %v3324_v21 }
 0xd10   : > { %v3328_v23 = vpop.eup %3327  ;;  %3329 = vrcp.f32 %v2289_v22  ;;  %v2291_v24 = vadd.f32 1.0, %v3326_v11 }
 0xd11   : > { %3331 = vrcp.f32 %v2290_v14  ;;  %v2292_v25 = vadd.f32 1.0, %v3328_v23 }
 0xd12   : > { %3333 = vrcp.f32 %v2291_v24 }
 0xd13   : > { %3335 = vrcp.f32 %v2292_v25 }
 0xd1a   : > { %v3330_v9 = vpop.eup %3329 }
 0xd1b   : > { %v3332_v26 = vpop.eup %3331  ;;  %v2301_v29 = vmul.f32 %v3330_v9, %v2265_v4 }
 0xd1c   : > { %v3334_v27 = vpop.eup %3333  ;;  %v2302_v31 = vmul.f32 %v3332_v26, %v2267_v6 }
 0xd1d   : > { %v3336_v28 = vpop.eup %3335  ;;  %v2303_v30 = vmul.f32 %v3334_v27, %v2269_v8 }
 0xd1e   : > { %v2304_v32 = vmul.f32 %v3336_v28, %v2271_v12 }
 0xd1f   : > { %v2305_v33 = vpack.c.bf16 %v2303_v30, %v2301_v29 }
 0xd20   : > { %v2306_v34 = vpack.c.bf16 %v2304_v32, %v2302_v31 }
 0xd22   : > { %2474 = vmatprep.mubr.bf16.mxu1 %v2306_v34 }
 0xd23   : > { %2475 = vmatmul.mubr.bf16.vlgmr.msra.gmra.mrb[16].mxu1 %v2305_v33 }
 0xdf6   : > { %v2998_v35 = vpop.f32.mrb[16].mxu1 }
 0xdf7   : > { %v2999_v37 = vpop.f32.mrb[17].mxu1 }
 0xdf8   : > { %v3000_v38 = vadd.f32 %v2999_v37, %v2998_v35  ;;  %v3001_v39 = vpop.f32.mrb[18].mxu1 }
 0xdf9   : > { %v3002_v40 = vpop.f32.mrb[19].mxu1 }
 0xdfa   : > { %v2477_v41 = vadd.f32 %v3000_v38, %v2894_v36  ;;  %v3003_v61 = vadd.f32 %v3002_v40, %v3001_v39  ;;  %2490 = sbr.rel (%p2911_p8) target bundleno = 4126 (0x101e), region = 112 }
 0xdfc   : > { %v2483_v62 = vadd.f32 %v2477_v41, %v3830_v60  ;;  %v2480_v42 = vadd.f32 %v3003_v61, %v2894_v36 }
 0xdfe   : > { %2485 = vst.msk [vmem:[#allocation2] sm:$0xff] %vm905_vm1, %v2483_v62  ;;  %v2484_v43 = vadd.f32 %v2480_v42, %v3833_v1 }
 0xe00   : > { %2486 = vst.msk [vmem:[#allocation2 + $0x8] sm:$0xff] %vm905_vm1, %v2484_v43 }
 0xe07   : > { %v2493_v48 = vld [vmem:[%s2492_s28] sm:$0x1] }
 0xe08   : > { %v2496_v17 = vld [vmem:[%s2495_s27] sm:$0x1] }
 0xe09   : > { %v2498_v44 = vrot.slane %v2496_v17, 7 }
 0xe0b   : > { %v2501_v60 = vsel %vm2500_vm7, %v2493_v48, %v2498_v44 }
 0xe0c   : > { %v2505_v45 = vsel %vm2504_vm8, %v2501_v60, 0.0 }
 0xe0d   : > { %2506 = vadd.xlane.f32.xlu0 %v2505_v45 }
 0xe9a   : > { %v2507_v46 = vpop.xlane.xlu0 %2506 }
 0xe9b   : > { %v2508_v47 = vmul.f32 0.015625, %v2507_v46 }
 0xe9d   : > { %v2509_v1 = vsub.f32 %v2501_v60, %v2508_v47 }
 0xe9f   : > { %v2510_v49 = vmul.f32 %v2509_v1, %v2509_v1 }
 0xea1   : > { %v2511_v52 = vsel %vm2504_vm8, %v2510_v49, 0.0 }
 0xea2   : > { %2512 = vadd.xlane.f32.xlu0 %v2511_v52 }
 0xf2f   : > { %v2513_v56 = vpop.xlane.xlu0 %2512 }
 0xf30   : > { %v2514_v57 = vmul.f32 0.015625, %v2513_v56 }
 0xf32   : > { %v2515_v58 = vadd.f32 1e-05, %v2514_v57 }
 0xf34   : > { %3341 = vrsqrt.f32 %v2515_v58 }
 0xf3e   : > { %v3342_v63 = vpop.eup %3341 }
 0xf3f   : > { %v2517_v4 = vmul.f32 %v3342_v63, %v2509_v1 }
 0xf41   : > { %v2524_v6 = vmul.f32 %v2913_v0, %v2517_v4 }
 0xf43   : > { %v2531_v7 = vadd.f32 %v2914_v5, %v2524_v6 }
 0xf45   : > { %v2532_v2 = vpack.c.bf16 %v2531_v7, %v2531_v7 }
 0xf47   : > { %3122 = vmatmul.mubr.msk.bf16.vlgmr.msra.gmra.mrb[0].mxu0 %vm905_vm1, %v2532_v2 }
0x101a   : > { %v2602_v8 = vpop.f32.mrb[0].mxu0 }
0x101b   : > { %2609 = vst.msk [vmem:[#allocation5] sm:$0x3] %vm2608_vm10, %v2602_v8  ;;  %v3123_v10 = vpop.f32.mrb[1].mxu0 }
0x101c   : > { %v2605_v3 = vpop.f32.mrb[2].mxu0 }
0x101d   : > { %v3124_v12 = vpop.f32.mrb[3].mxu0 }
0x101e PF: > { %p3169_p9 = scmp.eq.s32.totalorder %s3539_s16, 1  ;;  %s3405_s19 = smov [#allocation5]  }
0x101f   : > { %s2617_s25 = sshll.u32 %s3405_s19, 4  ;;  %s2618_s25 = int_to_ptr.vmem [resolvable:$true] %s2617_s25 }
0x1020   : > { %s3353_s9 = scalar_lea.vmem %s2618_s25, 32  ;;  %p3360_p13 = scmp.lt.s32.totalorder %s2618_s25, %s2618_s25 }
0x1021   : > { %p3354_p10 = scmp.ne.s32.totalorder %s2618_s25, %s3353_s9  ;;  %p3361_p0 = scmp.lt.s32.totalorder %s3353_s9, %s3353_s9 }
0x1023   : > { %p3355_p11 = pnand %p3354_p10, %p3169_p9  ;;  %p3362_p1 = por %p3361_p0, %p3360_p13 }
0x1025   : > { %p3356_p12 = pneg %p3355_p11 }
0x1027   : > { %p3363_p2 = pnand %p3362_p1, %p3356_p12 }
0x1029   : > { %3366 = shalt.err (!%p3363_p2)
}
0x102a   : > { %s4005_s21 = sld [smem:[#allocation24_spill]] }
0x1030   : > { %s3367_s1 = scalar_lea.hbm %s4005_s21, 32 }
0x1031   : > { %p3368_p3 = scmp.ne.s32.totalorder %s4005_s21, %s3367_s1  ;;  %p3373_p6 = scmp.lt.u32.totalorder %s3367_s1, %s4005_s21 }
0x1033   : > { %p3369_p4 = pnand %p3368_p3, %p3169_p9 }
0x1035   : > { %p3370_p5 = pneg %p3369_p4 }
0x1037   : > { %p3375_p7 = pnand %p3373_p6, %p3370_p5 }
0x1039   : > { %3378 = shalt.err (!%p3375_p7)
}
0x103a   : > { %3166 = dma.vmem_to_hbm [thread:$0]  (%p3169_p9), %s2618_s25, 32, %s4005_s21, [#allocation6]  }
0x103b   : > { %3386 = dma.done.wait (%p3169_p9), [#allocation6], 32  }
0x103c   : > { %3388 = vsyncadd (%p3169_p9), [#allocation6], 4294967264 }
0x103d PF: > { %s4006_s2 = sld [smem:[#allocation9_spill]] }
0x1043   : > { %s37_s6 = sadd.s32 1, %s4006_s2  }
0x1044   : > { %p34_p8 = scmp.ge.s32.totalorder %s37_s6, 4  }
0x1046   :  { %36 = sbr.rel (!%p34_p8) target bundleno = 24 (0x18), region = 186 }
0x104d   :  { %2630 = vsyncpa [#allocation6], 1 }
0x104e   :  { %2632 = vsyncpa [#allocation6 + $0x1], 1 }

</bundles_post_ra>
